<compile_context>
chip_gen: v7x
topology: tpu7x:2x2x1
jax: 0.10.0
libtpu: 0.0.40
codegen_flags: <defaults>
</compile_context>

<pallas_src>
import jax
import jax.numpy as jnp
import numpy as np
from jax import lax
from jax.experimental import pallas as pl
from jax.experimental.pallas import tpu as pltpu


def decoder_kernel(ids_ref, emb_hbm, enc_ref, bias_ref,
                   wih_ref, bg_ref, bhn_ref,
                   wcat_h_ref, wcat_c_ref, bc_ref, wo_ref, bo_ref,
                   out_ref, hid_ref,
                   emb_buf, sem):
    # ids_ref : (B,)      int32, SMEM   token ids of this decode step
    # emb_hbm : (Vemb,H)  f32,   HBM    embedding table (DMA-gathered)
    # enc_ref : (S,B,H)   f32,   VMEM   encoder outputs, PyTorch seq-first layout
    # bias_ref: (S*B,B)   f32,   VMEM   0 where row's batch == column, -1e30 elsewhere
    B, H = hid_ref.shape
    S = enc_ref.shape[0]

    # ---- fused embedding gather: B small row-DMAs HBM -> VMEM ----------------------
    copies = []
    for b in range(B):
        cp = pltpu.make_async_copy(emb_hbm.at[pl.ds(ids_ref[b], 1), :],
                                   emb_buf.at[pl.ds(b, 1), :],
                                   sem.at[b])
        cp.start()
        copies.append(cp)
    for cp in copies:
        cp.wait()
    x = emb_buf[...]                                                        # (B, H)

    # ---- GRU cell, single step, h0 = 0 (module calls gru(embedded) w/o last_hidden) --
    # gi = x @ W_ih^T + (b_ih with b_hh folded into the r/z slices); only the "n" slice
    # of b_hh stays separate because it is multiplied by r.
    gi = jnp.dot(x, wih_ref[...], preferred_element_type=jnp.float32) + bg_ref[...]
    r = jax.nn.sigmoid(gi[:, 0:H])
    z = jax.nn.sigmoid(gi[:, H:2 * H])
    n = jnp.tanh(gi[:, 2 * H:3 * H] + r * bhn_ref[...])
    h_new = (1.0 - z) * n                                                   # + z*h0, h0 == 0
    hid_ref[...] = h_new                                                    # (B, H)

    # ---- dot attention on the MXU ----------------------------------------------------
    # Flatten (S,B,H)->(S*B,H): layout-preserving (minor dims (B,H) tile-aligned).
    e2 = enc_ref[...].reshape(S * B, H)                                     # (S*B, H)
    # scores_full[s*B+b, b'] = <enc[s,b,:], h_new[b',:]>;  only b'==b is meaningful.
    scores = lax.dot_general(e2, h_new, (((1,), (1,)), ((), ())),
                             preferred_element_type=jnp.float32)            # (S*B, B)
    m = scores + bias_ref[...]                      # invalid (b'!=b) entries -> ~-1e30
    col_max = jnp.max(m, axis=0, keepdims=True)                             # (1, B)
    p = jnp.exp(m - col_max)                        # invalid entries underflow to 0
    col_sum = jnp.sum(p, axis=0, keepdims=True)                             # (1, B)
    attn = p * pl.reciprocal(col_sum, approx=True)  # column b holds softmax_s(score[b,s])
    # context[b,h] = sum_s attn[b,s] * enc[s,b,h]  (zeros in attn kill the b'!=b rows)
    context = lax.dot_general(attn, e2, (((0,), (0,)), ((), ())),
                              preferred_element_type=jnp.float32)           # (B, H)

    # ---- concat + Linear(2H->H) as two H-wide matmuls + tanh --------------------------
    concat_out = jnp.tanh(
        jnp.dot(h_new, wcat_h_ref[...], preferred_element_type=jnp.float32)
        + jnp.dot(context, wcat_c_ref[...], preferred_element_type=jnp.float32)
        + bc_ref[...])                                                      # (B, H)

    # ---- output projection + softmax over vocab ---------------------------------------
    # TODO(synk): for realistic vocab sizes tile this matmul over a 'parallel' V grid axis.
    logits = jnp.dot(concat_out, wo_ref[...], preferred_element_type=jnp.float32) + bo_ref[...]
    logits = logits - jnp.max(logits, axis=1, keepdims=True)
    e = jnp.exp(logits)
    out_ref[...] = e / jnp.sum(e, axis=1, keepdims=True)                    # (B, V)


def decoder_forward(params, input_step, encoder_outputs):
    """input_step: (1, B) int32; encoder_outputs: (S, B, H) f32 (PyTorch seq-first layout)."""
    S, B, H = encoder_outputs.shape
    V = params["b_out"].shape[0]
    ids = input_step[0].astype(jnp.int32)                     # (B,)

    # Host-side (trace-time) weight prep: everything pre-transposed so the kernel does x @ W.
    w_ih_t = params["w_ih"].T                                 # (H, 3H)
    b_gates = jnp.concatenate(
        [params["b_ih"][:2 * H] + params["b_hh"][:2 * H],     # fold b_hh into r/z slices (h0 = 0)
         params["b_ih"][2 * H:]]).reshape(1, 3 * H)
    b_hn = params["b_hh"][2 * H:].reshape(1, H)               # "n" slice, scaled by r in-kernel
    w_cat_h = params["w_concat"][:, :H].T                     # (H, H)  acts on rnn_output
    w_cat_c = params["w_concat"][:, H:].T                     # (H, H)  acts on context
    b_c = params["b_concat"].reshape(1, H)
    w_o = params["w_out"].T                                   # (H, V)
    b_o = params["b_out"].reshape(1, V)

    # Additive mask implementing the per-batch softmax on the flattened (S*B, B) scores.
    rows = np.arange(S * B) % B
    attn_bias = jnp.asarray(
        np.where(rows[:, None] == np.arange(B)[None, :], 0.0, -1e30), dtype=jnp.float32)

    vmem = pltpu.MemorySpace.VMEM
    out_probs, hidden_bh = pl.pallas_call(
        decoder_kernel,
        out_shape=(jax.ShapeDtypeStruct((B, V), jnp.float32),
                   jax.ShapeDtypeStruct((B, H), jnp.float32)),
        in_specs=[
            pl.BlockSpec(memory_space=pltpu.MemorySpace.SMEM),   # token ids (scalars)
            pl.BlockSpec(memory_space=pl.ANY),                   # embedding table stays in HBM
            pl.BlockSpec(memory_space=vmem),                     # encoder outputs (S,B,H)
            pl.BlockSpec(memory_space=vmem),                     # attention mask bias
            pl.BlockSpec(memory_space=vmem),                     # W_ih^T
            pl.BlockSpec(memory_space=vmem),                     # fused gate bias
            pl.BlockSpec(memory_space=vmem),                     # b_hh (n slice)
            pl.BlockSpec(memory_space=vmem),                     # W_concat^T (rnn half)
            pl.BlockSpec(memory_space=vmem),                     # W_concat^T (context half)
            pl.BlockSpec(memory_space=vmem),                     # b_concat
            pl.BlockSpec(memory_space=vmem),                     # W_out^T
            pl.BlockSpec(memory_space=vmem),                     # b_out
        ],
        out_specs=(pl.BlockSpec(memory_space=vmem),
                   pl.BlockSpec(memory_space=vmem)),
        scratch_shapes=[
            pltpu.VMEM((B, H), jnp.float32),         # gathered embeddings
            pltpu.SemaphoreType.DMA((B,)),           # one DMA sem per gathered row
        ],
    )(ids, params["embedding"], encoder_outputs, attn_bias,
      w_ih_t, b_gates, b_hn, w_cat_h, w_cat_c, b_c, w_o, b_o)

    hidden = hidden_bh[None, :, :]                            # (1, B, H) like PyTorch GRU hidden
    return out_probs, hidden


def reference_forward(params, input_step, encoder_outputs):
    """Pure-JAX reference mirroring the PyTorch forward exactly."""
    emb = params["embedding"][input_step[0]]                  # (B, H)
    H = emb.shape[1]
    gi = emb @ params["w_ih"].T + params["b_ih"]
    gh = params["b_hh"]                                       # h0 = 0
    r = jax.nn.sigmoid(gi[:, :H] + gh[:H])
    z = jax.nn.sigmoid(gi[:, H:2 * H] + gh[H:2 * H])
    n = jnp.tanh(gi[:, 2 * H:] + r * gh[2 * H:])
    h_new = (1.0 - z) * n                                     # (B, H) == rnn_output == hidden
    scores = jnp.sum(h_new[None, :, :] * encoder_outputs, axis=2)   # (S, B)
    attn = jax.nn.softmax(scores.T, axis=1)                   # (B, S)
    context = jnp.einsum("bs,sbh->bh", attn, encoder_outputs)
    concat_in = jnp.concatenate([h_new, context], axis=1)
    concat_out = jnp.tanh(concat_in @ params["w_concat"].T + params["b_concat"])
    logits = concat_out @ params["w_out"].T + params["b_out"]
    return jax.nn.softmax(logits, axis=1), h_new[None]


def init_params(key, hidden_size, vocab_size):
    ks = jax.random.split(key, 8)
    s = 0.05
    return {
        "embedding": jax.random.normal(ks[0], (vocab_size, hidden_size), jnp.float32) * s,
        "w_ih": jax.random.normal(ks[1], (3 * hidden_size, hidden_size), jnp.float32) * s,
        "b_ih": jax.random.normal(ks[2], (3 * hidden_size,), jnp.float32) * s,
        "b_hh": jax.random.normal(ks[3], (3 * hidden_size,), jnp.float32) * s,
        "w_concat": jax.random.normal(ks[4], (hidden_size, 2 * hidden_size), jnp.float32) * s,
        "b_concat": jax.random.normal(ks[5], (hidden_size,), jnp.float32) * s,
        "w_out": jax.random.normal(ks[6], (vocab_size, hidden_size), jnp.float32) * s,
        "b_out": jax.random.normal(ks[7], (vocab_size,), jnp.float32) * s,
        # NOTE: GRU w_hh is omitted: the module calls gru(embedded) without last_hidden,
        # so h0 = 0 and W_hh @ h0 == 0; only b_hh contributes.
    }


if __name__ == "__main__":
    B, S, H, V = 8, 16, 128, 256
    key = jax.random.PRNGKey(0)
    kp, ki, ke = jax.random.split(key, 3)

    params = init_params(kp, H, V)
    input_step = jax.random.randint(ki, (1, B), 0, V, dtype=jnp.int32)      # (1, B) tokens
    encoder_outputs = jax.random.normal(ke, (S, B, H), jnp.float32)          # (S, B, H)

    decoder_jit = jax.jit(decoder_forward)
    out, hidden = decoder_jit(params, input_step, encoder_outputs)
    out = jax.block_until_ready(out)
    hidden = jax.block_until_ready(hidden)

    ref_out, ref_hidden = reference_forward(params, input_step, encoder_outputs)
    # Attention runs on the MXU (default TPU matmul precision rounds inputs to bf16) and its
    # softmax uses the approx-EUP reciprocal, while the reference is elementwise f32, so use
    # a 1e-3 tolerance.
    np.testing.assert_allclose(np.asarray(out), np.asarray(ref_out), rtol=1e-3, atol=1e-3)
    np.testing.assert_allclose(np.asarray(hidden), np.asarray(ref_hidden), rtol=1e-3, atol=1e-3)
    assert out.shape == (B, V) and hidden.shape == (1, B, H)

    print("KERNEL_OK")
</pallas_src>

<mosaic_0001>
module attributes {stable_mosaic.version = 11 : i64} {
  func.func @decoder_kernel(%arg0: memref<8xi32, #tpu.memory_space<smem>>, %arg1: memref<256x128xf32, #tpu.memory_space<any>>, %arg2: memref<16x8x128xf32, #tpu.memory_space<vmem>>, %arg3: memref<128x8xf32, #tpu.memory_space<vmem>>, %arg4: memref<128x384xf32, #tpu.memory_space<vmem>>, %arg5: memref<1x384xf32, #tpu.memory_space<vmem>>, %arg6: memref<1x128xf32, #tpu.memory_space<vmem>>, %arg7: memref<128x128xf32, #tpu.memory_space<vmem>>, %arg8: memref<128x128xf32, #tpu.memory_space<vmem>>, %arg9: memref<1x128xf32, #tpu.memory_space<vmem>>, %arg10: memref<128x256xf32, #tpu.memory_space<vmem>>, %arg11: memref<1x256xf32, #tpu.memory_space<vmem>>, %arg12: memref<8x256xf32, #tpu.memory_space<vmem>>, %arg13: memref<8x128xf32, #tpu.memory_space<vmem>>, %arg14: memref<8x128xf32, #tpu.memory_space<vmem>>, %arg15: memref<8x!tpu.dma_semaphore, #tpu.memory_space<semaphore_mem>>) attributes {dimension_semantics = [], scalar_prefetch = 0 : i64, scratch_operands = 2 : i64, tpu.core_type = #tpu.core_type<tc>} {
    %c0 = arith.constant 0 : index
    %0 = memref.load %arg0[%c0] : memref<8xi32, #tpu.memory_space<smem>>
    %c0_i32 = arith.constant 0 : i32
    %c0_i32_0 = arith.constant 0 : i32
    %1 = tpu.memref_slice %arg1[%0, %c0_i32_0] : memref<256x128xf32, #tpu.memory_space<any>> -> memref<1x128xf32, #tpu.memory_space<any>>
    %c0_i32_1 = arith.constant 0 : i32
    %c0_i32_2 = arith.constant 0 : i32
    %2 = tpu.memref_slice %arg14[%c0_i32_1, %c0_i32_2] : memref<8x128xf32, #tpu.memory_space<vmem>> -> memref<1x128xf32, #tpu.memory_space<vmem>>
    %3 = tpu.memref_slice %arg15[%c0_i32] : memref<8x!tpu.dma_semaphore, #tpu.memory_space<semaphore_mem>> -> memref<1x!tpu.dma_semaphore, #tpu.memory_space<semaphore_mem>>
    %4 = tpu.memref_squeeze %3 : memref<1x!tpu.dma_semaphore, #tpu.memory_space<semaphore_mem>> -> memref<!tpu.dma_semaphore, #tpu.memory_space<semaphore_mem>>
    tpu.enqueue_dma source(%1 : memref<1x128xf32, #tpu.memory_space<any>>) target(%2 : memref<1x128xf32, #tpu.memory_space<vmem>>) target_semaphore(%4 : memref<!tpu.dma_semaphore, #tpu.memory_space<semaphore_mem>>)
    %c1 = arith.constant 1 : index
    %5 = memref.load %arg0[%c1] : memref<8xi32, #tpu.memory_space<smem>>
    %c1_i32 = arith.constant 1 : i32
    %c0_i32_3 = arith.constant 0 : i32
    %6 = tpu.memref_slice %arg1[%5, %c0_i32_3] : memref<256x128xf32, #tpu.memory_space<any>> -> memref<1x128xf32, #tpu.memory_space<any>>
    %c1_i32_4 = arith.constant 1 : i32
    %c0_i32_5 = arith.constant 0 : i32
    %7 = tpu.memref_slice %arg14[%c1_i32_4, %c0_i32_5] : memref<8x128xf32, #tpu.memory_space<vmem>> -> memref<1x128xf32, #tpu.memory_space<vmem>>
    %8 = tpu.memref_slice %arg15[%c1_i32] : memref<8x!tpu.dma_semaphore, #tpu.memory_space<semaphore_mem>> -> memref<1x!tpu.dma_semaphore, #tpu.memory_space<semaphore_mem>>
    %9 = tpu.memref_squeeze %8 : memref<1x!tpu.dma_semaphore, #tpu.memory_space<semaphore_mem>> -> memref<!tpu.dma_semaphore, #tpu.memory_space<semaphore_mem>>
    tpu.enqueue_dma source(%6 : memref<1x128xf32, #tpu.memory_space<any>>) target(%7 : memref<1x128xf32, #tpu.memory_space<vmem>>) target_semaphore(%9 : memref<!tpu.dma_semaphore, #tpu.memory_space<semaphore_mem>>)
    %c2 = arith.constant 2 : index
    %10 = memref.load %arg0[%c2] : memref<8xi32, #tpu.memory_space<smem>>
    %c2_i32 = arith.constant 2 : i32
    %c0_i32_6 = arith.constant 0 : i32
    %11 = tpu.memref_slice %arg1[%10, %c0_i32_6] : memref<256x128xf32, #tpu.memory_space<any>> -> memref<1x128xf32, #tpu.memory_space<any>>
    %c2_i32_7 = arith.constant 2 : i32
    %c0_i32_8 = arith.constant 0 : i32
    %12 = tpu.memref_slice %arg14[%c2_i32_7, %c0_i32_8] : memref<8x128xf32, #tpu.memory_space<vmem>> -> memref<1x128xf32, #tpu.memory_space<vmem>>
    %13 = tpu.memref_slice %arg15[%c2_i32] : memref<8x!tpu.dma_semaphore, #tpu.memory_space<semaphore_mem>> -> memref<1x!tpu.dma_semaphore, #tpu.memory_space<semaphore_mem>>
    %14 = tpu.memref_squeeze %13 : memref<1x!tpu.dma_semaphore, #tpu.memory_space<semaphore_mem>> -> memref<!tpu.dma_semaphore, #tpu.memory_space<semaphore_mem>>
    tpu.enqueue_dma source(%11 : memref<1x128xf32, #tpu.memory_space<any>>) target(%12 : memref<1x128xf32, #tpu.memory_space<vmem>>) target_semaphore(%14 : memref<!tpu.dma_semaphore, #tpu.memory_space<semaphore_mem>>)
    %c3 = arith.constant 3 : index
    %15 = memref.load %arg0[%c3] : memref<8xi32, #tpu.memory_space<smem>>
    %c3_i32 = arith.constant 3 : i32
    %c0_i32_9 = arith.constant 0 : i32
    %16 = tpu.memref_slice %arg1[%15, %c0_i32_9] : memref<256x128xf32, #tpu.memory_space<any>> -> memref<1x128xf32, #tpu.memory_space<any>>
    %c3_i32_10 = arith.constant 3 : i32
    %c0_i32_11 = arith.constant 0 : i32
    %17 = tpu.memref_slice %arg14[%c3_i32_10, %c0_i32_11] : memref<8x128xf32, #tpu.memory_space<vmem>> -> memref<1x128xf32, #tpu.memory_space<vmem>>
    %18 = tpu.memref_slice %arg15[%c3_i32] : memref<8x!tpu.dma_semaphore, #tpu.memory_space<semaphore_mem>> -> memref<1x!tpu.dma_semaphore, #tpu.memory_space<semaphore_mem>>
    %19 = tpu.memref_squeeze %18 : memref<1x!tpu.dma_semaphore, #tpu.memory_space<semaphore_mem>> -> memref<!tpu.dma_semaphore, #tpu.memory_space<semaphore_mem>>
    tpu.enqueue_dma source(%16 : memref<1x128xf32, #tpu.memory_space<any>>) target(%17 : memref<1x128xf32, #tpu.memory_space<vmem>>) target_semaphore(%19 : memref<!tpu.dma_semaphore, #tpu.memory_space<semaphore_mem>>)
    %c4 = arith.constant 4 : index
    %20 = memref.load %arg0[%c4] : memref<8xi32, #tpu.memory_space<smem>>
    %c4_i32 = arith.constant 4 : i32
    %c0_i32_12 = arith.constant 0 : i32
    %21 = tpu.memref_slice %arg1[%20, %c0_i32_12] : memref<256x128xf32, #tpu.memory_space<any>> -> memref<1x128xf32, #tpu.memory_space<any>>
    %c4_i32_13 = arith.constant 4 : i32
    %c0_i32_14 = arith.constant 0 : i32
    %22 = tpu.memref_slice %arg14[%c4_i32_13, %c0_i32_14] : memref<8x128xf32, #tpu.memory_space<vmem>> -> memref<1x128xf32, #tpu.memory_space<vmem>>
    %23 = tpu.memref_slice %arg15[%c4_i32] : memref<8x!tpu.dma_semaphore, #tpu.memory_space<semaphore_mem>> -> memref<1x!tpu.dma_semaphore, #tpu.memory_space<semaphore_mem>>
    %24 = tpu.memref_squeeze %23 : memref<1x!tpu.dma_semaphore, #tpu.memory_space<semaphore_mem>> -> memref<!tpu.dma_semaphore, #tpu.memory_space<semaphore_mem>>
    tpu.enqueue_dma source(%21 : memref<1x128xf32, #tpu.memory_space<any>>) target(%22 : memref<1x128xf32, #tpu.memory_space<vmem>>) target_semaphore(%24 : memref<!tpu.dma_semaphore, #tpu.memory_space<semaphore_mem>>)
    %c5 = arith.constant 5 : index
    %25 = memref.load %arg0[%c5] : memref<8xi32, #tpu.memory_space<smem>>
    %c5_i32 = arith.constant 5 : i32
    %c0_i32_15 = arith.constant 0 : i32
    %26 = tpu.memref_slice %arg1[%25, %c0_i32_15] : memref<256x128xf32, #tpu.memory_space<any>> -> memref<1x128xf32, #tpu.memory_space<any>>
    %c5_i32_16 = arith.constant 5 : i32
    %c0_i32_17 = arith.constant 0 : i32
    %27 = tpu.memref_slice %arg14[%c5_i32_16, %c0_i32_17] : memref<8x128xf32, #tpu.memory_space<vmem>> -> memref<1x128xf32, #tpu.memory_space<vmem>>
    %28 = tpu.memref_slice %arg15[%c5_i32] : memref<8x!tpu.dma_semaphore, #tpu.memory_space<semaphore_mem>> -> memref<1x!tpu.dma_semaphore, #tpu.memory_space<semaphore_mem>>
    %29 = tpu.memref_squeeze %28 : memref<1x!tpu.dma_semaphore, #tpu.memory_space<semaphore_mem>> -> memref<!tpu.dma_semaphore, #tpu.memory_space<semaphore_mem>>
    tpu.enqueue_dma source(%26 : memref<1x128xf32, #tpu.memory_space<any>>) target(%27 : memref<1x128xf32, #tpu.memory_space<vmem>>) target_semaphore(%29 : memref<!tpu.dma_semaphore, #tpu.memory_space<semaphore_mem>>)
    %c6 = arith.constant 6 : index
    %30 = memref.load %arg0[%c6] : memref<8xi32, #tpu.memory_space<smem>>
    %c6_i32 = arith.constant 6 : i32
    %c0_i32_18 = arith.constant 0 : i32
    %31 = tpu.memref_slice %arg1[%30, %c0_i32_18] : memref<256x128xf32, #tpu.memory_space<any>> -> memref<1x128xf32, #tpu.memory_space<any>>
    %c6_i32_19 = arith.constant 6 : i32
    %c0_i32_20 = arith.constant 0 : i32
    %32 = tpu.memref_slice %arg14[%c6_i32_19, %c0_i32_20] : memref<8x128xf32, #tpu.memory_space<vmem>> -> memref<1x128xf32, #tpu.memory_space<vmem>>
    %33 = tpu.memref_slice %arg15[%c6_i32] : memref<8x!tpu.dma_semaphore, #tpu.memory_space<semaphore_mem>> -> memref<1x!tpu.dma_semaphore, #tpu.memory_space<semaphore_mem>>
    %34 = tpu.memref_squeeze %33 : memref<1x!tpu.dma_semaphore, #tpu.memory_space<semaphore_mem>> -> memref<!tpu.dma_semaphore, #tpu.memory_space<semaphore_mem>>
    tpu.enqueue_dma source(%31 : memref<1x128xf32, #tpu.memory_space<any>>) target(%32 : memref<1x128xf32, #tpu.memory_space<vmem>>) target_semaphore(%34 : memref<!tpu.dma_semaphore, #tpu.memory_space<semaphore_mem>>)
    %c7 = arith.constant 7 : index
    %35 = memref.load %arg0[%c7] : memref<8xi32, #tpu.memory_space<smem>>
    %c7_i32 = arith.constant 7 : i32
    %c0_i32_21 = arith.constant 0 : i32
    %36 = tpu.memref_slice %arg1[%35, %c0_i32_21] : memref<256x128xf32, #tpu.memory_space<any>> -> memref<1x128xf32, #tpu.memory_space<any>>
    %c7_i32_22 = arith.constant 7 : i32
    %c0_i32_23 = arith.constant 0 : i32
    %37 = tpu.memref_slice %arg14[%c7_i32_22, %c0_i32_23] : memref<8x128xf32, #tpu.memory_space<vmem>> -> memref<1x128xf32, #tpu.memory_space<vmem>>
    %38 = tpu.memref_slice %arg15[%c7_i32] : memref<8x!tpu.dma_semaphore, #tpu.memory_space<semaphore_mem>> -> memref<1x!tpu.dma_semaphore, #tpu.memory_space<semaphore_mem>>
    %39 = tpu.memref_squeeze %38 : memref<1x!tpu.dma_semaphore, #tpu.memory_space<semaphore_mem>> -> memref<!tpu.dma_semaphore, #tpu.memory_space<semaphore_mem>>
    tpu.enqueue_dma source(%36 : memref<1x128xf32, #tpu.memory_space<any>>) target(%37 : memref<1x128xf32, #tpu.memory_space<vmem>>) target_semaphore(%39 : memref<!tpu.dma_semaphore, #tpu.memory_space<semaphore_mem>>)
    %c0_i32_24 = arith.constant 0 : i32
    %c0_i32_25 = arith.constant 0 : i32
    %40 = tpu.memref_slice %arg1[%0, %c0_i32_25] : memref<256x128xf32, #tpu.memory_space<any>> -> memref<1x128xf32, #tpu.memory_space<any>>
    %c0_i32_26 = arith.constant 0 : i32
    %c0_i32_27 = arith.constant 0 : i32
    %41 = tpu.memref_slice %arg14[%c0_i32_26, %c0_i32_27] : memref<8x128xf32, #tpu.memory_space<vmem>> -> memref<1x128xf32, #tpu.memory_space<vmem>>
    %42 = tpu.memref_slice %arg15[%c0_i32_24] : memref<8x!tpu.dma_semaphore, #tpu.memory_space<semaphore_mem>> -> memref<1x!tpu.dma_semaphore, #tpu.memory_space<semaphore_mem>>
    %43 = tpu.memref_squeeze %42 : memref<1x!tpu.dma_semaphore, #tpu.memory_space<semaphore_mem>> -> memref<!tpu.dma_semaphore, #tpu.memory_space<semaphore_mem>>
    tpu.wait_dma2 semaphore(%43 : memref<!tpu.dma_semaphore, #tpu.memory_space<semaphore_mem>>) src(%40 : memref<1x128xf32, #tpu.memory_space<any>>) dst(%41 : memref<1x128xf32, #tpu.memory_space<vmem>>)
    %c1_i32_28 = arith.constant 1 : i32
    %c0_i32_29 = arith.constant 0 : i32
    %44 = tpu.memref_slice %arg1[%5, %c0_i32_29] : memref<256x128xf32, #tpu.memory_space<any>> -> memref<1x128xf32, #tpu.memory_space<any>>
    %c1_i32_30 = arith.constant 1 : i32
    %c0_i32_31 = arith.constant 0 : i32
    %45 = tpu.memref_slice %arg14[%c1_i32_30, %c0_i32_31] : memref<8x128xf32, #tpu.memory_space<vmem>> -> memref<1x128xf32, #tpu.memory_space<vmem>>
    %46 = tpu.memref_slice %arg15[%c1_i32_28] : memref<8x!tpu.dma_semaphore, #tpu.memory_space<semaphore_mem>> -> memref<1x!tpu.dma_semaphore, #tpu.memory_space<semaphore_mem>>
    %47 = tpu.memref_squeeze %46 : memref<1x!tpu.dma_semaphore, #tpu.memory_space<semaphore_mem>> -> memref<!tpu.dma_semaphore, #tpu.memory_space<semaphore_mem>>
    tpu.wait_dma2 semaphore(%47 : memref<!tpu.dma_semaphore, #tpu.memory_space<semaphore_mem>>) src(%44 : memref<1x128xf32, #tpu.memory_space<any>>) dst(%45 : memref<1x128xf32, #tpu.memory_space<vmem>>)
    %c2_i32_32 = arith.constant 2 : i32
    %c0_i32_33 = arith.constant 0 : i32
    %48 = tpu.memref_slice %arg1[%10, %c0_i32_33] : memref<256x128xf32, #tpu.memory_space<any>> -> memref<1x128xf32, #tpu.memory_space<any>>
    %c2_i32_34 = arith.constant 2 : i32
    %c0_i32_35 = arith.constant 0 : i32
    %49 = tpu.memref_slice %arg14[%c2_i32_34, %c0_i32_35] : memref<8x128xf32, #tpu.memory_space<vmem>> -> memref<1x128xf32, #tpu.memory_space<vmem>>
    %50 = tpu.memref_slice %arg15[%c2_i32_32] : memref<8x!tpu.dma_semaphore, #tpu.memory_space<semaphore_mem>> -> memref<1x!tpu.dma_semaphore, #tpu.memory_space<semaphore_mem>>
    %51 = tpu.memref_squeeze %50 : memref<1x!tpu.dma_semaphore, #tpu.memory_space<semaphore_mem>> -> memref<!tpu.dma_semaphore, #tpu.memory_space<semaphore_mem>>
    tpu.wait_dma2 semaphore(%51 : memref<!tpu.dma_semaphore, #tpu.memory_space<semaphore_mem>>) src(%48 : memref<1x128xf32, #tpu.memory_space<any>>) dst(%49 : memref<1x128xf32, #tpu.memory_space<vmem>>)
    %c3_i32_36 = arith.constant 3 : i32
    %c0_i32_37 = arith.constant 0 : i32
    %52 = tpu.memref_slice %arg1[%15, %c0_i32_37] : memref<256x128xf32, #tpu.memory_space<any>> -> memref<1x128xf32, #tpu.memory_space<any>>
    %c3_i32_38 = arith.constant 3 : i32
    %c0_i32_39 = arith.constant 0 : i32
    %53 = tpu.memref_slice %arg14[%c3_i32_38, %c0_i32_39] : memref<8x128xf32, #tpu.memory_space<vmem>> -> memref<1x128xf32, #tpu.memory_space<vmem>>
    %54 = tpu.memref_slice %arg15[%c3_i32_36] : memref<8x!tpu.dma_semaphore, #tpu.memory_space<semaphore_mem>> -> memref<1x!tpu.dma_semaphore, #tpu.memory_space<semaphore_mem>>
    %55 = tpu.memref_squeeze %54 : memref<1x!tpu.dma_semaphore, #tpu.memory_space<semaphore_mem>> -> memref<!tpu.dma_semaphore, #tpu.memory_space<semaphore_mem>>
    tpu.wait_dma2 semaphore(%55 : memref<!tpu.dma_semaphore, #tpu.memory_space<semaphore_mem>>) src(%52 : memref<1x128xf32, #tpu.memory_space<any>>) dst(%53 : memref<1x128xf32, #tpu.memory_space<vmem>>)
    %c4_i32_40 = arith.constant 4 : i32
    %c0_i32_41 = arith.constant 0 : i32
    %56 = tpu.memref_slice %arg1[%20, %c0_i32_41] : memref<256x128xf32, #tpu.memory_space<any>> -> memref<1x128xf32, #tpu.memory_space<any>>
    %c4_i32_42 = arith.constant 4 : i32
    %c0_i32_43 = arith.constant 0 : i32
    %57 = tpu.memref_slice %arg14[%c4_i32_42, %c0_i32_43] : memref<8x128xf32, #tpu.memory_space<vmem>> -> memref<1x128xf32, #tpu.memory_space<vmem>>
    %58 = tpu.memref_slice %arg15[%c4_i32_40] : memref<8x!tpu.dma_semaphore, #tpu.memory_space<semaphore_mem>> -> memref<1x!tpu.dma_semaphore, #tpu.memory_space<semaphore_mem>>
    %59 = tpu.memref_squeeze %58 : memref<1x!tpu.dma_semaphore, #tpu.memory_space<semaphore_mem>> -> memref<!tpu.dma_semaphore, #tpu.memory_space<semaphore_mem>>
    tpu.wait_dma2 semaphore(%59 : memref<!tpu.dma_semaphore, #tpu.memory_space<semaphore_mem>>) src(%56 : memref<1x128xf32, #tpu.memory_space<any>>) dst(%57 : memref<1x128xf32, #tpu.memory_space<vmem>>)
    %c5_i32_44 = arith.constant 5 : i32
    %c0_i32_45 = arith.constant 0 : i32
    %60 = tpu.memref_slice %arg1[%25, %c0_i32_45] : memref<256x128xf32, #tpu.memory_space<any>> -> memref<1x128xf32, #tpu.memory_space<any>>
    %c5_i32_46 = arith.constant 5 : i32
    %c0_i32_47 = arith.constant 0 : i32
    %61 = tpu.memref_slice %arg14[%c5_i32_46, %c0_i32_47] : memref<8x128xf32, #tpu.memory_space<vmem>> -> memref<1x128xf32, #tpu.memory_space<vmem>>
    %62 = tpu.memref_slice %arg15[%c5_i32_44] : memref<8x!tpu.dma_semaphore, #tpu.memory_space<semaphore_mem>> -> memref<1x!tpu.dma_semaphore, #tpu.memory_space<semaphore_mem>>
    %63 = tpu.memref_squeeze %62 : memref<1x!tpu.dma_semaphore, #tpu.memory_space<semaphore_mem>> -> memref<!tpu.dma_semaphore, #tpu.memory_space<semaphore_mem>>
    tpu.wait_dma2 semaphore(%63 : memref<!tpu.dma_semaphore, #tpu.memory_space<semaphore_mem>>) src(%60 : memref<1x128xf32, #tpu.memory_space<any>>) dst(%61 : memref<1x128xf32, #tpu.memory_space<vmem>>)
    %c6_i32_48 = arith.constant 6 : i32
    %c0_i32_49 = arith.constant 0 : i32
    %64 = tpu.memref_slice %arg1[%30, %c0_i32_49] : memref<256x128xf32, #tpu.memory_space<any>> -> memref<1x128xf32, #tpu.memory_space<any>>
    %c6_i32_50 = arith.constant 6 : i32
    %c0_i32_51 = arith.constant 0 : i32
    %65 = tpu.memref_slice %arg14[%c6_i32_50, %c0_i32_51] : memref<8x128xf32, #tpu.memory_space<vmem>> -> memref<1x128xf32, #tpu.memory_space<vmem>>
    %66 = tpu.memref_slice %arg15[%c6_i32_48] : memref<8x!tpu.dma_semaphore, #tpu.memory_space<semaphore_mem>> -> memref<1x!tpu.dma_semaphore, #tpu.memory_space<semaphore_mem>>
    %67 = tpu.memref_squeeze %66 : memref<1x!tpu.dma_semaphore, #tpu.memory_space<semaphore_mem>> -> memref<!tpu.dma_semaphore, #tpu.memory_space<semaphore_mem>>
    tpu.wait_dma2 semaphore(%67 : memref<!tpu.dma_semaphore, #tpu.memory_space<semaphore_mem>>) src(%64 : memref<1x128xf32, #tpu.memory_space<any>>) dst(%65 : memref<1x128xf32, #tpu.memory_space<vmem>>)
    %c7_i32_52 = arith.constant 7 : i32
    %c0_i32_53 = arith.constant 0 : i32
    %68 = tpu.memref_slice %arg1[%35, %c0_i32_53] : memref<256x128xf32, #tpu.memory_space<any>> -> memref<1x128xf32, #tpu.memory_space<any>>
    %c7_i32_54 = arith.constant 7 : i32
    %c0_i32_55 = arith.constant 0 : i32
    %69 = tpu.memref_slice %arg14[%c7_i32_54, %c0_i32_55] : memref<8x128xf32, #tpu.memory_space<vmem>> -> memref<1x128xf32, #tpu.memory_space<vmem>>
    %70 = tpu.memref_slice %arg15[%c7_i32_52] : memref<8x!tpu.dma_semaphore, #tpu.memory_space<semaphore_mem>> -> memref<1x!tpu.dma_semaphore, #tpu.memory_space<semaphore_mem>>
    %71 = tpu.memref_squeeze %70 : memref<1x!tpu.dma_semaphore, #tpu.memory_space<semaphore_mem>> -> memref<!tpu.dma_semaphore, #tpu.memory_space<semaphore_mem>>
    tpu.wait_dma2 semaphore(%71 : memref<!tpu.dma_semaphore, #tpu.memory_space<semaphore_mem>>) src(%68 : memref<1x128xf32, #tpu.memory_space<any>>) dst(%69 : memref<1x128xf32, #tpu.memory_space<vmem>>)
    %c0_56 = arith.constant 0 : index
    %c0_57 = arith.constant 0 : index
    %72 = vector.load %arg14[%c0_56, %c0_57] : memref<8x128xf32, #tpu.memory_space<vmem>>, vector<8x128xf32>
    %c0_58 = arith.constant 0 : index
    %c0_59 = arith.constant 0 : index
    %73 = vector.load %arg4[%c0_58, %c0_59] : memref<128x384xf32, #tpu.memory_space<vmem>>, vector<128x384xf32>
    %cst = arith.constant dense<0.000000e+00> : vector<8x384xf32>
    %74 = tpu.matmul %72, %73, %cst {dimension_numbers = #tpu.dot_dimension_numbers<[1], [0], [0], [1], [0, 0, 1, 1], [], []>} : vector<8x128xf32>, vector<128x384xf32>, vector<8x384xf32> -> vector<8x384xf32>
    %c0_60 = arith.constant 0 : index
    %c0_61 = arith.constant 0 : index
    %75 = vector.load %arg5[%c0_60, %c0_61] : memref<1x384xf32, #tpu.memory_space<vmem>>, vector<1x384xf32>
    %76 = vector.broadcast %75 : vector<1x384xf32> to vector<8x384xf32>
    %77 = arith.addf %74, %76 : vector<8x384xf32>
    %78 = vector.extract_strided_slice %77 {offsets = [0, 0], sizes = [8, 128], strides = [1, 1]} : vector<8x384xf32> to vector<8x128xf32>
    %79 = arith.negf %78 : vector<8x128xf32>
    %80 = math.exp %79 : vector<8x128xf32>
    %cst_62 = arith.constant 1.000000e+00 : f32
    %81 = vector.broadcast %cst_62 : f32 to vector<8x128xf32>
    %82 = arith.addf %81, %80 : vector<8x128xf32>
    %83 = arith.divf %81, %82 : vector<8x128xf32>
    %84 = vector.extract_strided_slice %77 {offsets = [0, 128], sizes = [8, 128], strides = [1, 1]} : vector<8x384xf32> to vector<8x128xf32>
    %85 = arith.negf %84 : vector<8x128xf32>
    %86 = math.exp %85 : vector<8x128xf32>
    %cst_63 = arith.constant 1.000000e+00 : f32
    %87 = vector.broadcast %cst_63 : f32 to vector<8x128xf32>
    %88 = arith.addf %87, %86 : vector<8x128xf32>
    %89 = arith.divf %87, %88 : vector<8x128xf32>
    %90 = vector.extract_strided_slice %77 {offsets = [0, 256], sizes = [8, 128], strides = [1, 1]} : vector<8x384xf32> to vector<8x128xf32>
    %c0_64 = arith.constant 0 : index
    %c0_65 = arith.constant 0 : index
    %91 = vector.load %arg6[%c0_64, %c0_65] : memref<1x128xf32, #tpu.memory_space<vmem>>, vector<1x128xf32>
    %92 = vector.broadcast %91 : vector<1x128xf32> to vector<8x128xf32>
    %93 = arith.mulf %83, %92 : vector<8x128xf32>
    %94 = arith.addf %90, %93 : vector<8x128xf32>
    %95 = math.tanh %94 : vector<8x128xf32>
    %cst_66 = arith.constant 1.000000e+00 : f32
    %96 = vector.broadcast %cst_66 : f32 to vector<8x128xf32>
    %97 = arith.subf %96, %89 : vector<8x128xf32>
    %98 = arith.mulf %97, %95 : vector<8x128xf32>
    %c0_67 = arith.constant 0 : index
    %c0_68 = arith.constant 0 : index
    %99 = vector.load %arg13[%c0_67, %c0_68] : memref<8x128xf32, #tpu.memory_space<vmem>>, vector<8x128xf32>
    tpu.vector_store %arg13[%c0_67, %c0_68], %98 {strides = array<i32>} : memref<8x128xf32, #tpu.memory_space<vmem>>, vector<8x128xf32>,
    %c0_69 = arith.constant 0 : index
    %c0_70 = arith.constant 0 : index
    %c0_71 = arith.constant 0 : index
    %100 = vector.load %arg2[%c0_69, %c0_70, %c0_71] : memref<16x8x128xf32, #tpu.memory_space<vmem>>, vector<16x8x128xf32>
    %101 = vector.shape_cast %100 : vector<16x8x128xf32> to vector<128x128xf32>
    %cst_72 = arith.constant dense<0.000000e+00> : vector<128x8xf32>
    %102 = tpu.matmul %101, %98, %cst_72 {dimension_numbers = #tpu.dot_dimension_numbers<[1], [1], [0], [0], [0, 0, 1, 0], [], []>} : vector<128x128xf32>, vector<8x128xf32>, vector<128x8xf32> -> vector<128x8xf32>
    %c0_73 = arith.constant 0 : index
    %c0_74 = arith.constant 0 : index
    %103 = vector.load %arg3[%c0_73, %c0_74] : memref<128x8xf32, #tpu.memory_space<vmem>>, vector<128x8xf32>
    %104 = arith.addf %102, %103 : vector<128x8xf32>
    %cst_75 = arith.constant dense<0xFF800000> : vector<8xf32>
    %105 = vector.multi_reduction <maximumf>, %104, %cst_75 [0] : vector<128x8xf32> to vector<8xf32>
    %106 = vector.shape_cast %105 : vector<8xf32> to vector<1x8xf32>
    %107 = vector.broadcast %106 : vector<1x8xf32> to vector<128x8xf32>
    %108 = arith.subf %104, %107 : vector<128x8xf32>
    %109 = math.exp %108 : vector<128x8xf32>
    %cst_76 = arith.constant dense<0.000000e+00> : vector<8xf32>
    %110 = vector.multi_reduction <add>, %109, %cst_76 [0] : vector<128x8xf32> to vector<8xf32>
    %111 = vector.shape_cast %110 : vector<8xf32> to vector<1x8xf32>
    %112 = tpu.reciprocal %111 {approx = true} : vector<1x8xf32> -> vector<1x8xf32>
    %113 = vector.broadcast %112 : vector<1x8xf32> to vector<128x8xf32>
    %114 = arith.mulf %109, %113 : vector<128x8xf32>
    %cst_77 = arith.constant dense<0.000000e+00> : vector<8x128xf32>
    %115 = tpu.matmul %114, %101, %cst_77 {dimension_numbers = #tpu.dot_dimension_numbers<[0], [0], [1], [1], [0, 1, 1, 1], [], []>} : vector<128x8xf32>, vector<128x128xf32>, vector<8x128xf32> -> vector<8x128xf32>
    %c0_78 = arith.constant 0 : index
    %c0_79 = arith.constant 0 : index
    %116 = vector.load %arg7[%c0_78, %c0_79] : memref<128x128xf32, #tpu.memory_space<vmem>>, vector<128x128xf32>
    %cst_80 = arith.constant dense<0.000000e+00> : vector<8x128xf32>
    %117 = tpu.matmul %98, %116, %cst_80 {dimension_numbers = #tpu.dot_dimension_numbers<[1], [0], [0], [1], [0, 0, 1, 1], [], []>} : vector<8x128xf32>, vector<128x128xf32>, vector<8x128xf32> -> vector<8x128xf32>
    %c0_81 = arith.constant 0 : index
    %c0_82 = arith.constant 0 : index
    %118 = vector.load %arg8[%c0_81, %c0_82] : memref<128x128xf32, #tpu.memory_space<vmem>>, vector<128x128xf32>
    %cst_83 = arith.constant dense<0.000000e+00> : vector<8x128xf32>
    %119 = tpu.matmul %115, %118, %cst_83 {dimension_numbers = #tpu.dot_dimension_numbers<[1], [0], [0], [1], [0, 0, 1, 1], [], []>} : vector<8x128xf32>, vector<128x128xf32>, vector<8x128xf32> -> vector<8x128xf32>
    %120 = arith.addf %117, %119 : vector<8x128xf32>
    %c0_84 = arith.constant 0 : index
    %c0_85 = arith.constant 0 : index
    %121 = vector.load %arg9[%c0_84, %c0_85] : memref<1x128xf32, #tpu.memory_space<vmem>>, vector<1x128xf32>
    %122 = vector.broadcast %121 : vector<1x128xf32> to vector<8x128xf32>
    %123 = arith.addf %120, %122 : vector<8x128xf32>
    %124 = math.tanh %123 : vector<8x128xf32>
    %c0_86 = arith.constant 0 : index
    %c0_87 = arith.constant 0 : index
    %125 = vector.load %arg10[%c0_86, %c0_87] : memref<128x256xf32, #tpu.memory_space<vmem>>, vector<128x256xf32>
    %cst_88 = arith.constant dense<0.000000e+00> : vector<8x256xf32>
    %126 = tpu.matmul %124, %125, %cst_88 {dimension_numbers = #tpu.dot_dimension_numbers<[1], [0], [0], [1], [0, 0, 1, 1], [], []>} : vector<8x128xf32>, vector<128x256xf32>, vector<8x256xf32> -> vector<8x256xf32>
    %c0_89 = arith.constant 0 : index
    %c0_90 = arith.constant 0 : index
    %127 = vector.load %arg11[%c0_89, %c0_90] : memref<1x256xf32, #tpu.memory_space<vmem>>, vector<1x256xf32>
    %128 = vector.broadcast %127 : vector<1x256xf32> to vector<8x256xf32>
    %129 = arith.addf %126, %128 : vector<8x256xf32>
    %cst_91 = arith.constant dense<0xFF800000> : vector<8xf32>
    %130 = vector.multi_reduction <maximumf>, %129, %cst_91 [1] : vector<8x256xf32> to vector<8xf32>
    %131 = vector.shape_cast %130 : vector<8xf32> to vector<8x1xf32>
    %132 = vector.broadcast %131 : vector<8x1xf32> to vector<8x256xf32>
    %133 = arith.subf %129, %132 : vector<8x256xf32>
    %134 = math.exp %133 : vector<8x256xf32>
    %cst_92 = arith.constant dense<0.000000e+00> : vector<8xf32>
    %135 = vector.multi_reduction <add>, %134, %cst_92 [1] : vector<8x256xf32> to vector<8xf32>
    %136 = vector.shape_cast %135 : vector<8xf32> to vector<8x1xf32>
    %137 = vector.broadcast %136 : vector<8x1xf32> to vector<8x256xf32>
    %138 = arith.divf %134, %137 : vector<8x256xf32>
    %c0_93 = arith.constant 0 : index
    %c0_94 = arith.constant 0 : index
    %139 = vector.load %arg12[%c0_93, %c0_94] : memref<8x256xf32, #tpu.memory_space<vmem>>, vector<8x256xf32>
    tpu.vector_store %arg12[%c0_93, %c0_94], %138 {strides = array<i32>} : memref<8x256xf32, #tpu.memory_space<vmem>>, vector<8x256xf32>,
    return
  }
}

</mosaic_0001>

<bundles_post_ra>
// kernel: decoder_forward.1
= control target key start
LH: loop header
LB: loop body
LE: loop exit
PB: predicated region body
PF: predicated region fallthrough
CT: control target
= control target key end

     0   :  { %19 = vsyncpa [#allocation6], 0  ;;  %s2974_s0 = inlined_call_operand.vmem [shape: s32[8], index: 0, kind: input, shape index: {}]   ;;  %s2975_s1 = inlined_call_operand.vmem [shape: f32[256,128], index: 1, kind: input, shape index: {}]   ;;  %s2976_s2 = inlined_call_operand.vmem [shape: f32[16,8,128], index: 2, kind: input, shape index: {}]   ;;  %s2977_s3 = inlined_call_operand.vmem [shape: f32[128,8], index: 3, kind: input, shape index: {}]   ;;  %s2978_s4 = inlined_call_operand.vmem [shape: f32[128,384], index: 4, kind: input, shape index: {}]   ;;  %s2979_s5 = inlined_call_operand.vmem [shape: f32[1,384], index: 5, kind: input, shape index: {}]   ;;  %s2980_s6 = inlined_call_operand.vmem [shape: f32[1,128], index: 6, kind: input, shape index: {}]   ;;  %s2981_s7 = inlined_call_operand.vmem [shape: f32[128,128], index: 7, kind: input, shape index: {}]   ;;  %s2982_s8 = inlined_call_operand.vmem [shape: f32[128,128], index: 8, kind: input, shape index: {}]   ;;  %s2983_s9 = inlined_call_operand.vmem [shape: f32[1,128], index: 9, kind: input, shape index: {}]   ;;  %s2984_s10 = inlined_call_operand.vmem [shape: f32[128,256], index: 10, kind: input, shape index: {}]   ;;  %s2985_s11 = inlined_call_operand.vmem [shape: f32[1,256], index: 11, kind: input, shape index: {}]   ;;  %s2986_s12 = inlined_call_operand.hbm [shape: f32[8,256], index: 12, kind: output, shape index: {0}]   ;;  %s2987_s13 = inlined_call_operand.hbm [shape: f32[8,128], index: 13, kind: output, shape index: {1}]  }
   0x1   :  { %20 = vsyncpa [#allocation5], 0 }
   0x2   :  { %21 = vsyncpa [#allocation9], 0  ;;  %s28_s27 = sshll.u32 %s2974_s0, 4  ;;  %s29_s27 = int_to_ptr.vmem [resolvable:$true] %s28_s27 }
   0x3   :  { %s2086_s28 = scalar_lea.vmem %s29_s27, 16  ;;  %p2091_p1 = scmp.lt.s32.totalorder %s29_s27, %s29_s27 }
   0x4   :  { %p2087_p0 = scmp.ne.s32.totalorder %s29_s27, %s2086_s28  ;;  %p2092_p2 = scmp.lt.s32.totalorder %s2086_s28, %s2086_s28 }
   0x6   :  { %p2093_p3 = por %p2092_p2, %p2091_p1 }
   0x8   :  { %p2094_p4 = pnand %p2093_p3, %p2087_p0 }
   0xa   :  { %2097 = shalt.err (!%p2094_p4)
}
   0xb   :  { %s2164_s29 = smov [#allocation4]  }
   0xc   :  { %31 = dma.vmem_to_smem %s29_s27, 16, %s2164_s29, [#allocation6]  }
   0xd   :  { %2142 = dma.done.wait [#allocation6], 16  }
   0xe   :  { %2143 = vsyncadd [#allocation6], 4294967280 }
   0xf   :  { %55 = sfence }
  0x10   :  { %s56_s30 = sld [smem:[#allocation4]] }
  0x16   :  { %s57_s16 = scalar_lea.vmem %s2975_s1, %s56_s30 }
  0x17   :  { %v75_v0 = vld [vmem:[%s57_s16] sm:$0x1] }
  0x18   :  { %76 = vst [vmem:[#allocation2] sm:$0x1] %v75_v0 }
  0x19   :  { %101 = vsyncadd [#allocation3], 16  ;;  %s1598_s0 = sld [smem:[#allocation4 + $0x1]] }
  0x1f   :  { %s103_s19 = scalar_lea.vmem %s2975_s1, %s1598_s0 }
  0x20   :  { %v123_v1 = vld [vmem:[%s103_s19] sm:$0x1] }
  0x21   :  { %124 = vst [vmem:[#allocation2 + $0x1] sm:$0x1] %v123_v1 }
  0x22   :  { %149 = vsyncadd [#allocation3 + $0x1], 16  ;;  %s1599_s20 = sld [smem:[#allocation4 + $0x2]] }
  0x28   :  { %s151_s23 = scalar_lea.vmem %s2975_s1, %s1599_s20 }
  0x29   :  { %v171_v2 = vld [vmem:[%s151_s23] sm:$0x1] }
  0x2a   :  { %172 = vst [vmem:[#allocation2 + $0x2] sm:$0x1] %v171_v2 }
  0x2b   :  { %197 = vsyncadd [#allocation3 + $0x2], 16  ;;  %s1600_s24 = sld [smem:[#allocation4 + $0x3]] }
  0x31   :  { %s199_s27 = scalar_lea.vmem %s2975_s1, %s1600_s24 }
  0x32   :  { %v219_v3 = vld [vmem:[%s199_s27] sm:$0x1] }
  0x33   :  { %220 = vst [vmem:[#allocation2 + $0x3] sm:$0x1] %v219_v3 }
  0x34   :  { %245 = vsyncadd [#allocation3 + $0x3], 16  ;;  %s1601_s28 = sld [smem:[#allocation4 + $0x4]] }
  0x3a   :  { %s247_s14 = scalar_lea.vmem %s2975_s1, %s1601_s28 }
  0x3b   :  { %v267_v4 = vld [vmem:[%s247_s14] sm:$0x1] }
  0x3c   :  { %268 = vst [vmem:[#allocation2 + $0x4] sm:$0x1] %v267_v4 }
  0x3d   :  { %293 = vsyncadd [#allocation3 + $0x4], 16  ;;  %s1602_s15 = sld [smem:[#allocation4 + $0x5]] }
  0x43   :  { %s295_s17 = scalar_lea.vmem %s2975_s1, %s1602_s15 }
  0x44   :  { %v315_v5 = vld [vmem:[%s295_s17] sm:$0x1] }
  0x45   :  { %316 = vst [vmem:[#allocation2 + $0x5] sm:$0x1] %v315_v5 }
  0x46   :  { %341 = vsyncadd [#allocation3 + $0x5], 16  ;;  %s1603_s18 = sld [smem:[#allocation4 + $0x6]] }
  0x4c   :  { %s343_s21 = scalar_lea.vmem %s2975_s1, %s1603_s18 }
  0x4d   :  { %v363_v6 = vld [vmem:[%s343_s21] sm:$0x1] }
  0x4e   :  { %364 = vst [vmem:[#allocation2 + $0x6] sm:$0x1] %v363_v6 }
  0x4f   :  { %389 = vsyncadd [#allocation3 + $0x6], 16  ;;  %s1604_s22 = sld [smem:[#allocation4 + $0x7]] }
  0x55   :  { %s391_s25 = scalar_lea.vmem %s2975_s1, %s1604_s22 }
  0x56   :  { %v411_v7 = vld [vmem:[%s391_s25] sm:$0x1] }
  0x57   :  { %412 = vst [vmem:[#allocation2 + $0x7] sm:$0x1] %v411_v7 }
  0x58   :  { %437 = vsyncadd [#allocation3 + $0x7], 16 }
  0x59   :  { %2144 = dma.done.wait [#allocation3], 16 }
  0x5a   :  { %2145 = vsyncadd [#allocation3], 4294967280 }
  0x5b   :  { %2146 = dma.done.wait [#allocation3 + $0x1], 16 }
  0x5c   :  { %2147 = vsyncadd [#allocation3 + $0x1], 4294967280 }
  0x5d   :  { %2148 = dma.done.wait [#allocation3 + $0x2], 16 }
  0x5e   :  { %2149 = vsyncadd [#allocation3 + $0x2], 4294967280 }
  0x5f   :  { %2150 = dma.done.wait [#allocation3 + $0x3], 16 }
  0x60   :  { %2151 = vsyncadd [#allocation3 + $0x3], 4294967280 }
  0x61   :  { %2152 = dma.done.wait [#allocation3 + $0x4], 16 }
  0x62   :  { %2153 = vsyncadd [#allocation3 + $0x4], 4294967280 }
  0x63   :  { %2154 = dma.done.wait [#allocation3 + $0x5], 16 }
  0x64   :  { %2155 = vsyncadd [#allocation3 + $0x5], 4294967280 }
  0x65   :  { %2156 = dma.done.wait [#allocation3 + $0x6], 16 }
  0x66   :  { %2157 = vsyncadd [#allocation3 + $0x6], 4294967280 }
  0x67   :  { %2158 = dma.done.wait [#allocation3 + $0x7], 16 }
  0x68   :  { %2159 = vsyncadd [#allocation3 + $0x7], 4294967280  ;;  %v2165_v8 = vmov 0.0|0.0   ;;  %v2166_v9 = vmov 0.0   ;;  %vm2167_vm0 = vmmov 0   ;;  %v457_v10 = vld [vmem:[%s2978_s4 + $0x8] sm:$0xff] }
  0x69   :  { %1900 = vmatprep.subr.bf16.mxu1 %v2165_v8  ;;  %585 = vmatprep.mubr.f32.mxu0 %v2166_v9  ;;  %v460_v11 = vld [vmem:[%s2978_s4 + $0x20] sm:$0xff]  ;;  %v459_v14 = vld [vmem:[%s2978_s4 + $0x18] sm:$0xff]  ;;  %v466_v16 = vld [vmem:[%s2978_s4 + $0x50] sm:$0xff]  ;;  %vm864_vm1 = vcmask 64512  }
  0x6a   :  { %1734 = vmatprep.mubr.msk.f32.mxu1 %vm2167_vm0, %v2166_v9  ;;  %v456_v12 = vld [vmem:[%s2978_s4] sm:$0xff]  ;;  %v1868_v13 = vpack.c.bf16 %v460_v11, %v457_v10  ;;  %v463_v15 = vld [vmem:[%s2978_s4 + $0x38] sm:$0xff]  ;;  %v462_v19 = vld [vmem:[%s2978_s4 + $0x30] sm:$0xff] }
  0x6b   :  { %v1870_v17 = vpack.c.bf16 %v459_v14, %v456_v12  ;;  %v1872_v18 = vpack.c.bf16 %v466_v16, %v463_v15  ;;  %v465_v20 = vld [vmem:[%s2978_s4 + $0x48] sm:$0xff]  ;;  %v472_v22 = vld [vmem:[%s2978_s4 + $0x80] sm:$0xff]  ;;  %v471_v26 = vld [vmem:[%s2978_s4 + $0x78] sm:$0xff] }
  0x6c   :  { %v469_v21 = vld [vmem:[%s2978_s4 + $0x68] sm:$0xff]  ;;  %1869 = vmatprep.subr.bf16.mxu0 %v1868_v13  ;;  %v1874_v23 = vpack.c.bf16 %v465_v20, %v462_v19  ;;  %v468_v25 = vld [vmem:[%s2978_s4 + $0x60] sm:$0xff]  ;;  %v475_v27 = vld [vmem:[%s2978_s4 + $0x98] sm:$0xff] }
  0x6d   :  { %1871 = vmatpush1.bf16.msra.mxu0 %v1870_v17  ;;  %v1876_v24 = vpack.c.bf16 %v472_v22, %v469_v21  ;;  %v478_v28 = vld [vmem:[%s2978_s4 + $0xb0] sm:$0xff]  ;;  %v1878_v29 = vpack.c.bf16 %v471_v26, %v468_v25  ;;  %v477_v32 = vld [vmem:[%s2978_s4 + $0xa8] sm:$0xff]  ;;  %v484_v34 = vld [vmem:[%s2978_s4 + $0xe0] sm:$0xff] }
  0x6e   :  { %1873 = vmatprep.subr.bf16.mxu0 %v1872_v18  ;;  %v1880_v30 = vpack.c.bf16 %v478_v28, %v475_v27  ;;  %v474_v31 = vld [vmem:[%s2978_s4 + $0x90] sm:$0xff]  ;;  %v481_v33 = vld [vmem:[%s2978_s4 + $0xc8] sm:$0xff]  ;;  %v464_v38 = vld [vmem:[%s2978_s4 + $0x40] sm:$0xff] }
  0x6f   :  { %v458_v35 = vld [vmem:[%s2978_s4 + $0x10] sm:$0xff]  ;;  %v461_v36 = vld [vmem:[%s2978_s4 + $0x28] sm:$0xff]  ;;  %v1882_v39 = vpack.c.bf16 %v477_v32, %v474_v31  ;;  %v467_v40 = vld [vmem:[%s2978_s4 + $0x58] sm:$0xff]  ;;  %v1884_v41 = vpack.c.bf16 %v484_v34, %v481_v33 }
  0x70   :  { %v1901_v37 = vpack.c.bf16 %v461_v36, %v458_v35  ;;  %v480_v42 = vld [vmem:[%s2978_s4 + $0xc0] sm:$0xff]  ;;  %v483_v43 = vld [vmem:[%s2978_s4 + $0xd8] sm:$0xff]  ;;  %v1904_v45 = vpack.c.bf16 %v467_v40, %v464_v38  ;;  %v490_v46 = vld [vmem:[%s2978_s4 + $0x110] sm:$0xff] }
  0x71   :  { %1875 = vmatpush1.bf16.msra.mxu0 %v1874_v23  ;;  %v487_v44 = vld [vmem:[%s2978_s4 + $0xf8] sm:$0xff]  ;;  %v470_v47 = vld [vmem:[%s2978_s4 + $0x70] sm:$0xff]  ;;  %v473_v48 = vld [vmem:[%s2978_s4 + $0x88] sm:$0xff]  ;;  %v1886_v49 = vpack.c.bf16 %v483_v43, %v480_v42 }
  0x72   :  { %1877 = vmatprep.subr.bf16.mxu0 %v1876_v24  ;;  %1902 = vmatpush3.bf16.msra.mxu1 %v1901_v37  ;;  %v1888_v50 = vpack.c.bf16 %v490_v46, %v487_v44  ;;  %v486_v51 = vld [vmem:[%s2978_s4 + $0xf0] sm:$0xff]  ;;  %v489_v52 = vld [vmem:[%s2978_s4 + $0x108] sm:$0xff]  ;;  %v1907_v54 = vpack.c.bf16 %v473_v48, %v470_v47  ;;  %v496_v55 = vld [vmem:[%s2978_s4 + $0x140] sm:$0xff] }
  0x73   :  { %1903 = vmatprep.subr.bf16.mxu1 %v2165_v8  ;;  %v493_v53 = vld [vmem:[%s2978_s4 + $0x128] sm:$0xff]  ;;  %v476_v56 = vld [vmem:[%s2978_s4 + $0xa0] sm:$0xff]  ;;  %v479_v57 = vld [vmem:[%s2978_s4 + $0xb8] sm:$0xff]  ;;  %v1890_v58 = vpack.c.bf16 %v489_v52, %v486_v51 }
  0x74   :  { %v1892_v59 = vpack.c.bf16 %v496_v55, %v493_v53  ;;  %v492_v60 = vld [vmem:[%s2978_s4 + $0x120] sm:$0xff]  ;;  %v495_v61 = vld [vmem:[%s2978_s4 + $0x138] sm:$0xff]  ;;  %v1910_v63 = vpack.c.bf16 %v479_v57, %v476_v56  ;;  %v502_v0 = vld [vmem:[%s2978_s4 + $0x170] sm:$0xff] }
  0x75   :  { %1879 = vmatpush1.bf16.msra.mxu0 %v1878_v29  ;;  %v499_v62 = vld [vmem:[%s2978_s4 + $0x158] sm:$0xff]  ;;  %v482_v1 = vld [vmem:[%s2978_s4 + $0xd0] sm:$0xff]  ;;  %v485_v2 = vld [vmem:[%s2978_s4 + $0xe8] sm:$0xff]  ;;  %v1894_v3 = vpack.c.bf16 %v495_v61, %v492_v60 }
  0x76   :  { %1881 = vmatprep.subr.bf16.mxu0 %v1880_v30  ;;  %1905 = vmatpush3.bf16.msra.mxu1 %v1904_v45  ;;  %v1896_v4 = vpack.c.bf16 %v502_v0, %v499_v62  ;;  %v498_v5 = vld [vmem:[%s2978_s4 + $0x150] sm:$0xff]  ;;  %v501_v6 = vld [vmem:[%s2978_s4 + $0x168] sm:$0xff]  ;;  %v1913_v7 = vpack.c.bf16 %v485_v2, %v482_v1  ;;  %v488_v10 = vld [vmem:[%s2978_s4 + $0x100] sm:$0xff]  ;;  %v506_v45 = vlaneseq }
  0x77   :  { %1906 = vmatprep.subr.bf16.mxu1 %v2165_v8  ;;  %v491_v11 = vld [vmem:[%s2978_s4 + $0x118] sm:$0xff]  ;;  %v1898_v12 = vpack.c.bf16 %v501_v6, %v498_v5  ;;  %v494_v14 = vld [vmem:[%s2978_s4 + $0x130] sm:$0xff]  ;;  %v497_v15 = vld [vmem:[%s2978_s4 + $0x148] sm:$0xff] }
  0x78   :  { %v1916_v13 = vpack.c.bf16 %v491_v11, %v488_v10  ;;  %v455_v16 = vld [vmem:[#allocation2] sm:$0xff]  ;;  %v1919_v17 = vpack.c.bf16 %v497_v15, %v494_v14  ;;  %v503_v19 = vld [vmem:[%s2978_s4 + $0x178] sm:$0xff]  ;;  %v2431_v22 = vld [vmem:[%s2976_s2 + $0x8] sm:$0xff]  ;;  %v2514_v46 = vshrl.u32 %v506_v45, 7 }
  0x79   :  { %1883 = vmatpush1.bf16.msra.mxu0 %v1882_v39  ;;  %v500_v18 = vld [vmem:[%s2978_s4 + $0x160] sm:$0xff]  ;;  %v2438_v24 = vld [vmem:[%s2976_s2 + $0x10] sm:$0xff]  ;;  %v2443_v25 = vld [vmem:[%s2976_s2 + $0x18] sm:$0xff] }
  0x7a   :  { %1885 = vmatprep.subr.bf16.mxu0 %v1884_v41  ;;  %1908 = vmatpush3.bf16.msra.mxu1 %v1907_v54  ;;  %v1922_v20 = vpack.c.bf16 %v503_v19, %v500_v18  ;;  %v687_v21 = vld [vmem:[%s2976_s2] sm:$0xff]  ;;  %v1928_v26 = vpack.c.bf16 %v2443_v25, %v2438_v24  ;;  %v2455_v28 = vld [vmem:[%s2976_s2 + $0x28] sm:$0xff]  ;;  %v2463_v30 = vld [vmem:[%s2976_s2 + $0x30] sm:$0xff]  ;;  %v508_v47 = vsub.s32 0, %v2514_v46  ;;  %v516_v62 = vsub.s32 2, %v2514_v46 }
  0x7b   :  { %1909 = vmatprep.subr.bf16.mxu1 %v2165_v8  ;;  %v1925_v23 = vpack.c.bf16 %v2431_v22, %v687_v21  ;;  %v2450_v27 = vld [vmem:[%s2976_s2 + $0x20] sm:$0xff]  ;;  %v2468_v31 = vld [vmem:[%s2976_s2 + $0x38] sm:$0xff]  ;;  %v2481_v34 = vld [vmem:[%s2976_s2 + $0x48] sm:$0xff] }
  0x7c   :  { %v1931_v29 = vpack.c.bf16 %v2455_v28, %v2450_v27  ;;  %v1934_v32 = vpack.c.bf16 %v2468_v31, %v2463_v30  ;;  %v2476_v33 = vld [vmem:[%s2976_s2 + $0x40] sm:$0xff]  ;;  %v2489_v36 = vld [vmem:[%s2976_s2 + $0x50] sm:$0xff]  ;;  %v2494_v37 = vld [vmem:[%s2976_s2 + $0x58] sm:$0xff] }
  0x7d   :  { %1887 = vmatpush1.bf16.msra.mxu0 %v1886_v49  ;;  %v1937_v35 = vpack.c.bf16 %v2481_v34, %v2476_v33  ;;  %v1940_v38 = vpack.c.bf16 %v2494_v37, %v2489_v36  ;;  %v699_v39 = vld [vmem:[%s2976_s2 + $0x60] sm:$0xff]  ;;  %v700_v40 = vld [vmem:[%s2976_s2 + $0x68] sm:$0xff]  ;;  %v701_v42 = vld [vmem:[%s2976_s2 + $0x70] sm:$0xff]  ;;  %v512_v49 = vsub.s32 1, %v2514_v46 }
  0x7e   :  { %1889 = vmatprep.subr.bf16.mxu0 %v1888_v50  ;;  %1911 = vmatpush3.bf16.msra.mxu1 %v1910_v63  ;;  %v1943_v41 = vpack.c.bf16 %v700_v40, %v699_v39  ;;  %v702_v43 = vld [vmem:[%s2976_s2 + $0x78] sm:$0xff]  ;;  %v504_v48 = vld [vmem:[%s2979_s5] sm:$0x7]  ;;  %v704_v15 = vld [vmem:[%s2977_s3 + $0x8] sm:$0xff] }
  0x7f   :  { %1912 = vmatprep.subr.bf16.mxu1 %v2165_v8  ;;  %v1946_v44 = vpack.c.bf16 %v702_v43, %v701_v42  ;;  %v509_v50 = vrot.slane %v504_v48, %v508_v47  ;;  %v513_v52 = vrot.slane %v504_v48, %v512_v49  ;;  %v517_v0 = vrot.slane %v504_v48, %v516_v62  ;;  %v1607_v2 = vld [vmem:[%s2980_s6] ss:$0 sm:$0xff]  ;;  %v708_v19 = vld [vmem:[%s2977_s3 + $0x28] sm:$0xff] }
  0x80   :  { %v711_v48 = vld [vmem:[%s2977_s3 + $0x40] sm:$0xff] }
  0x81   :  { %1891 = vmatpush1.bf16.msra.mxu0 %v1890_v58 }
  0x82   :  { %1893 = vmatprep.subr.bf16.mxu0 %v1892_v59  ;;  %1914 = vmatpush3.bf16.msra.mxu1 %v1913_v7 }
  0x83   :  { %1915 = vmatprep.subr.bf16.mxu1 %v2165_v8 }
  0x85   :  { %1895 = vmatpush1.bf16.msra.mxu0 %v1894_v3 }
  0x86   :  { %1897 = vmatprep.subr.bf16.mxu0 %v1896_v4  ;;  %1917 = vmatpush3.bf16.msra.mxu1 %v1916_v13 }
  0x87   :  { %1918 = vmatprep.subr.bf16.mxu1 %v2165_v8 }
  0x89   :  { %1899 = vmatpush1.bf16.msra.mxu0 %v1898_v12 }
  0x8a   :  { %1920 = vmatpush3.bf16.msra.mxu1 %v1919_v17  ;;  %v703_v17 = vld [vmem:[%s2977_s3] sm:$0xff] }
  0x8b   :  { %1921 = vmatprep.subr.bf16.mxu1 %v2165_v8 }
  0x8c   :  { %586 = vmatmul.mubr.f32.vlgmr.msra.gmra.mrb[0].mxu0 %v455_v16 }
  0x8d   :  { %1739 = vmatprep.mubr.f32.mxu0 %v687_v21  ;;  %v707_v21 = vld [vmem:[%s2977_s3 + $0x20] sm:$0xff] }
  0x8e   :  { %1923 = vmatpush3.bf16.msra.mxu1 %v1922_v20 }
  0x8f   :  { %1924 = vmatprep.subr.bf16.mxu1 %v2165_v8 }
  0x91   :  { %1735 = vmatmul.mubr.f32.vlgmr.msra.gmra.mrb[0].mxu1 %v455_v16 }
  0x92   :  { %1795 = vmatprep.mubr.msk.f32.mxu1 %vm2167_vm0, %v2166_v9  ;;  %1926 = vmatpush3.bf16.msra.mxu1 %v1925_v23  ;;  %v706_v23 = vld [vmem:[%s2977_s3 + $0x18] sm:$0xff] }
  0x93   :  { %1927 = vmatprep.subr.bf16.mxu1 %v2165_v8 }
  0x96   :  { %1929 = vmatpush3.bf16.msra.mxu1 %v1928_v26 }
  0x97   :  { %1930 = vmatprep.subr.bf16.mxu1 %v2165_v8 }
  0x9a   :  { %1932 = vmatpush3.bf16.msra.mxu1 %v1931_v29  ;;  %v710_v29 = vld [vmem:[%s2977_s3 + $0x38] sm:$0xff] }
  0x9b   :  { %1933 = vmatprep.subr.bf16.mxu1 %v2165_v8 }
  0x9e   :  { %1935 = vmatpush3.bf16.msra.mxu1 %v1934_v32 }
  0x9f   :  { %1936 = vmatprep.subr.bf16.mxu1 %v2165_v8 }
  0xa2   :  { %1938 = vmatpush3.bf16.msra.mxu1 %v1937_v35 }
  0xa3   :  { %1939 = vmatprep.subr.bf16.mxu1 %v2165_v8 }
  0xa6   :  { %1941 = vmatpush3.bf16.msra.mxu1 %v1940_v38 }
  0xa7   :  { %1942 = vmatprep.subr.bf16.mxu1 %v2165_v8 }
  0xaa   :  { %1944 = vmatpush3.bf16.msra.mxu1 %v1943_v41 }
  0xab   :  { %1945 = vmatprep.subr.bf16.mxu1 %v2165_v8 }
  0xae   :  { %1947 = vmatpush3.bf16.msra.mxu1 %v1946_v44 }
  0xaf   :  { %1972 = vmatprep.subr.bf16.mxu1 %v2165_v8 }
 0x15f   :  { %v587_v51 = vpop.f32.mrb[0].mxu0 }
 0x160   :  { %v588_v53 = vadd.f32 %v587_v51, %v509_v50  ;;  %v589_v54 = vpop.f32.mrb[1].mxu0 }
 0x161   :  { %v590_v56 = vadd.f32 %v589_v54, %v513_v52 }
 0x162   :  { %v1605_v55 = vmul.f32 -1.442695, %v588_v53 }
 0x163   :  { %v1606_v57 = vmul.f32 -1.442695, %v590_v56 }
 0x164   :  { %2034 = vpow2.f32 %v1605_v55  ;;  %v658_v58 = vpop.f32.mrb[0].mxu1 }
 0x165   :  { %v1736_v59 = vpop.f32.mrb[1].mxu1  ;;  %2036 = vpow2.f32 %v1606_v57  ;;  %v659_v3 = vadd.f32 %v658_v58, %v517_v0  ;;  %v714_v58 = vld [vmem:[%s2977_s3 + $0x58] sm:$0xff] }
 0x16e   :  { %v2035_v60 = vpop.eup %2034 }
 0x16f   :  { %v665_v61 = vadd.f32 1.0, %v2035_v60  ;;  %v2037_v63 = vpop.eup %2036  ;;  %v713_v60 = vld [vmem:[%s2977_s3 + $0x50] sm:$0xff] }
 0x170   :  { %v671_v1 = vadd.f32 1.0, %v2037_v63 }
 0x171   :  { %2038 = vrcp.f32 %v665_v61 }
 0x172   :  { %2040 = vrcp.f32 %v671_v1 }
 0x17b   :  { %v2039_v4 = vpop.eup %2038 }
 0x17c   :  { %v681_v5 = vmul.f32 %v2039_v4, %v1607_v2  ;;  %v2041_v7 = vpop.eup %2040  ;;  %v716_v4 = vld [vmem:[%s2977_s3 + $0x68] sm:$0xff] }
 0x17d   :  { %v684_v10 = vsub.f32 1.0, %v2041_v7 }
 0x17e   :  { %v682_v6 = vadd.f32 %v681_v5, %v659_v3 }
 0x180   :  { %2042 = vtanh.f32 %v682_v6  ;;  %v715_v6 = vld [vmem:[%s2977_s3 + $0x60] sm:$0xff] }
 0x18a   :  { %v2043_v11 = vpop.eup %2042 }
 0x18b   :  { %v2529_v12 = vmul.f32 %v2043_v11, %v684_v10 }
 0x18d   :  { %1737 = vmatprep.subr.mxu0 %v2529_v12  ;;  %686 = vst [vmem:[#allocation8] sm:$0xff] %v2529_v12 }
 0x18e   :  { %1738 = vmatpush3.xpose.msra.mxu0 %v2529_v12 }
 0x18f   :  { %1948 = vmatprep.subr.bf16.mxu0 %v2165_v8 }
 0x191   :  { %1740 = vmatmul.mubr.f32.vlgmr.msra.gmra.mrb[2].mxu0 %v2431_v22 }
 0x192   :  { %1742 = vmatprep.mubr.f32.mxu0 %v2438_v24 }
 0x195   :  { %1743 = vmatmul.mubr.f32.gmra.mrb[4].mxu0 %v2443_v25  ;;  %v705_v25 = vld [vmem:[%s2977_s3 + $0x10] sm:$0xff] }
 0x196   :  { %1745 = vmatprep.mubr.f32.mxu0 %v2450_v27 }
 0x199   :  { %1746 = vmatmul.mubr.f32.gmra.mrb[6].mxu0 %v2455_v28 }
 0x19a   :  { %1748 = vmatprep.mubr.f32.mxu0 %v2463_v30 }
 0x19d   :  { %1749 = vmatmul.mubr.f32.gmra.mrb[8].mxu0 %v2468_v31 }
 0x19e   :  { %1751 = vmatprep.mubr.f32.mxu0 %v2476_v33  ;;  %v709_v33 = vld [vmem:[%s2977_s3 + $0x30] sm:$0xff] }
 0x1a1   :  { %1752 = vmatmul.mubr.f32.gmra.mrb[10].mxu0 %v2481_v34 }
 0x1a2   :  { %1754 = vmatprep.mubr.f32.mxu0 %v2489_v36 }
 0x1a5   :  { %1755 = vmatmul.mubr.f32.gmra.mrb[12].mxu0 %v2494_v37 }
 0x1a6   :  { %1757 = vmatprep.mubr.f32.mxu0 %v699_v39 }
 0x1a9   :  { %1758 = vmatmul.mubr.f32.gmra.mrb[14].mxu0 %v700_v40 }
 0x1aa   :  { %1760 = vmatprep.mubr.f32.mxu0 %v701_v42 }
 0x1ad   :  { %1761 = vmatmul.mubr.f32.gmra.mrb[16].mxu0 %v702_v43  ;;  %v712_v43 = vld [vmem:[%s2977_s3 + $0x48] sm:$0xff] }
 0x1ae   :  { %1830 = vmatprep.mubr.msk.f32.mxu0 %vm2167_vm0, %v2166_v9 }
 0x264   :  { %v1741_v13 = vpop.f32.mrb[2].mxu0 }
 0x265   :  { %v785_v14 = vpop.f32.mrb[3].mxu0  ;;  %v2557_v20 = vadd.f32 %v1741_v13, %v704_v15 }
 0x266   :  { %v2562_v22 = vadd.f32 %v785_v14, %v703_v17  ;;  %v718_v17 = vld [vmem:[%s2977_s3 + $0x78] sm:$0xff] }
 0x267   :  { %v866_v30 = vsel %vm864_vm1, %v2557_v20, -inf }
 0x268   :  { %v1744_v16 = vpop.f32.mrb[4].mxu0  ;;  %v865_v34 = vsel %vm864_vm1, %v2562_v22, -inf }
 0x269   :  { %v795_v18 = vpop.f32.mrb[5].mxu0  ;;  %v2579_v31 = vadd.f32 %v1744_v16, %v706_v23 }
 0x26a   :  { %v2588_v35 = vadd.f32 %v795_v18, %v705_v25 }
 0x26b   :  { %v868_v44 = vsel %vm864_vm1, %v2579_v31, -inf }
 0x26c   :  { %v1747_v24 = vpop.f32.mrb[6].mxu0  ;;  %v867_v50 = vsel %vm864_vm1, %v2588_v35, -inf }
 0x26d   :  { %v2570_v26 = vadd.f32 %v1747_v24, %v708_v19  ;;  %v805_v27 = vpop.f32.mrb[7].mxu0  ;;  %v717_v19 = vld [vmem:[%s2977_s3 + $0x70] sm:$0xff] }
 0x26e   :  { %v2572_v28 = vadd.f32 %v805_v27, %v707_v21 }
 0x26f   :  { %v871_v32 = vsel %vm864_vm1, %v2570_v26, -inf }
 0x270   :  { %v872_v36 = vmax.f32 %v866_v30, %v871_v32  ;;  %v869_v37 = vsel %vm864_vm1, %v2572_v28, -inf  ;;  %v1750_v38 = vpop.f32.mrb[8].mxu0 }
 0x271   :  { %v870_v39 = vmax.f32 %v865_v34, %v869_v37  ;;  %v2592_v40 = vadd.f32 %v1750_v38, %v710_v29  ;;  %v815_v41 = vpop.f32.mrb[9].mxu0 }
 0x272   :  { %v2594_v42 = vadd.f32 %v815_v41, %v709_v33 }
 0x273   :  { %v875_v45 = vsel %vm864_vm1, %v2592_v40, -inf }
 0x274   :  { %v876_v51 = vmax.f32 %v868_v44, %v875_v45  ;;  %v873_v52 = vsel %vm864_vm1, %v2594_v42, -inf  ;;  %v1753_v53 = vpop.f32.mrb[10].mxu0 }
 0x275   :  { %v874_v54 = vmax.f32 %v867_v50, %v873_v52  ;;  %v2610_v55 = vadd.f32 %v1753_v53, %v712_v43  ;;  %v825_v56 = vpop.f32.mrb[11].mxu0 }
 0x276   :  { %v2612_v57 = vadd.f32 %v825_v56, %v711_v48 }
 0x277   :  { %v879_v59 = vsel %vm864_vm1, %v2610_v55, -inf }
 0x278   :  { %v880_v61 = vmax.f32 %v872_v36, %v879_v59  ;;  %v877_v62 = vsel %vm864_vm1, %v2612_v57, -inf  ;;  %v1756_v63 = vpop.f32.mrb[12].mxu0 }
 0x279   :  { %v878_v0 = vmax.f32 %v870_v39, %v877_v62  ;;  %v2624_v1 = vadd.f32 %v1756_v63, %v714_v58  ;;  %v835_v2 = vpop.f32.mrb[13].mxu0 }
 0x27a   :  { %v2626_v3 = vadd.f32 %v835_v2, %v713_v60 }
 0x27b   :  { %v883_v5 = vsel %vm864_vm1, %v2624_v1, -inf }
 0x27c   :  { %v884_v7 = vmax.f32 %v876_v51, %v883_v5  ;;  %v881_v10 = vsel %vm864_vm1, %v2626_v3, -inf  ;;  %v1759_v11 = vpop.f32.mrb[14].mxu0 }
 0x27d   :  { %v882_v13 = vmax.f32 %v874_v54, %v881_v10  ;;  %v2638_v14 = vadd.f32 %v1759_v11, %v716_v4  ;;  %v845_v15 = vpop.f32.mrb[15].mxu0 }
 0x27e   :  { %v2640_v16 = vadd.f32 %v845_v15, %v715_v6 }
 0x27f   :  { %v887_v18 = vsel %vm864_vm1, %v2638_v14, -inf }
 0x280   :  { %v888_v21 = vmax.f32 %v880_v61, %v887_v18  ;;  %v885_v23 = vsel %vm864_vm1, %v2640_v16, -inf  ;;  %v1762_v24 = vpop.f32.mrb[16].mxu0 }
 0x281   :  { %v886_v25 = vmax.f32 %v878_v0, %v885_v23  ;;  %v2652_v27 = vadd.f32 %v1762_v24, %v718_v17  ;;  %v855_v29 = vpop.f32.mrb[17].mxu0 }
 0x282   :  { %v2654_v30 = vadd.f32 %v855_v29, %v717_v19 }
 0x283   :  { %v893_v32 = vmax.f32 %v886_v25, %v888_v21  ;;  %v891_v33 = vsel %vm864_vm1, %v2652_v27, -inf }
 0x284   :  { %v892_v34 = vmax.f32 %v884_v7, %v891_v33  ;;  %v889_v36 = vsel %vm864_vm1, %v2654_v30, -inf }
 0x285   :  { %v890_v37 = vmax.f32 %v882_v13, %v889_v36 }
 0x287   :  { %v894_v38 = vmax.f32 %v890_v37, %v892_v34 }
 0x289   :  { %v895_v39 = vmax.f32 %v893_v32, %v894_v38 }
 0x28b   :  { %v896_v41 = vrot.slane %v895_v39, 4 }
 0x28d   :  { %v897_v43 = vmax.f32 %v895_v39, %v896_v41 }
 0x28f   :  { %v898_v44 = vrot.slane %v897_v43, 2 }
 0x291   :  { %v899_v45 = vmax.f32 %v897_v43, %v898_v44 }
 0x293   :  { %v900_v48 = vrot.slane %v899_v45, 1 }
 0x295   :  { %v2660_v50 = vmax.f32 %v899_v45, %v900_v48 }
 0x297   :  { %v916_v51 = vsub.f32 %v2654_v30, %v2660_v50  ;;  %v902_v52 = vsub.f32 %v2562_v22, %v2660_v50  ;;  %v903_v53 = vsub.f32 %v2557_v20, %v2660_v50  ;;  %v904_v54 = vsub.f32 %v2588_v35, %v2660_v50 }
 0x298   :  { %v905_v56 = vsub.f32 %v2579_v31, %v2660_v50  ;;  %v906_v58 = vsub.f32 %v2572_v28, %v2660_v50  ;;  %v907_v59 = vsub.f32 %v2570_v26, %v2660_v50  ;;  %v908_v60 = vsub.f32 %v2594_v42, %v2660_v50 }
 0x299   :  { %v909_v22 = vsub.f32 %v2592_v40, %v2660_v50  ;;  %v910_v20 = vsub.f32 %v2612_v57, %v2660_v50  ;;  %v911_v35 = vsub.f32 %v2610_v55, %v2660_v50  ;;  %v912_v31 = vsub.f32 %v2626_v3, %v2660_v50 }
 0x29a   :  { %v913_v28 = vsub.f32 %v2624_v1, %v2660_v50  ;;  %v914_v26 = vsub.f32 %v2640_v16, %v2660_v50  ;;  %v915_v42 = vsub.f32 %v2638_v14, %v2660_v50  ;;  %v917_v40 = vsub.f32 %v2652_v27, %v2660_v50 }
 0x29b   :  { %v918_v61 = vmul.f32 1.442695, %v902_v52  ;;  %v920_v57 = vmul.f32 1.442695, %v903_v53  ;;  %v922_v62 = vmul.f32 1.442695, %v904_v54 }
 0x29c   :  { %v924_v63 = vmul.f32 1.442695, %v905_v56  ;;  %v926_v55 = vmul.f32 1.442695, %v906_v58  ;;  %v928_v0 = vmul.f32 1.442695, %v907_v59 }
 0x29d   :  { %2044 = vpow2.f32 %v918_v61  ;;  %v930_v1 = vmul.f32 1.442695, %v908_v60  ;;  %v932_v2 = vmul.f32 1.442695, %v909_v22  ;;  %v934_v3 = vmul.f32 1.442695, %v910_v20 }
 0x29e   :  { %2046 = vpow2.f32 %v920_v57  ;;  %v936_v6 = vmul.f32 1.442695, %v911_v35  ;;  %v938_v14 = vmul.f32 1.442695, %v912_v31  ;;  %v940_v18 = vmul.f32 1.442695, %v913_v28 }
 0x29f   :  { %2048 = vpow2.f32 %v922_v62  ;;  %v942_v24 = vmul.f32 1.442695, %v914_v26  ;;  %v944_v30 = vmul.f32 1.442695, %v915_v42  ;;  %v946_v36 = vmul.f32 1.442695, %v916_v51 }
 0x2a0   :  { %2050 = vpow2.f32 %v924_v63  ;;  %v948_v41 = vmul.f32 1.442695, %v917_v40 }
 0x2a1   :  { %2052 = vpow2.f32 %v926_v55 }
 0x2a2   :  { %2054 = vpow2.f32 %v928_v0 }
 0x2a3   :  { %2056 = vpow2.f32 %v930_v1 }
 0x2a4   :  { %2058 = vpow2.f32 %v932_v2 }
 0x2a5   :  { %2060 = vpow2.f32 %v934_v3 }
 0x2a6   :  { %2062 = vpow2.f32 %v936_v6 }
 0x2a7   :  { %v2694_v4 = vpop.eup %2044  ;;  %2064 = vpow2.f32 %v938_v14 }
 0x2a8   :  { %v2696_v5 = vpop.eup %2046  ;;  %v950_v7 = vsel %vm864_vm1, %v2694_v4, 0.0  ;;  %2066 = vpow2.f32 %v940_v18 }
 0x2a9   :  { %v2700_v10 = vpop.eup %2048  ;;  %v951_v11 = vsel %vm864_vm1, %v2696_v5, 0.0  ;;  %2068 = vpow2.f32 %v942_v24 }
 0x2aa   :  { %v2704_v13 = vpop.eup %2050  ;;  %v952_v15 = vadd.f32 %v951_v11, %v950_v7  ;;  %v953_v16 = vsel %vm864_vm1, %v2700_v10, 0.0  ;;  %2070 = vpow2.f32 %v944_v30 }
 0x2ab   :  { %v2708_v17 = vpop.eup %2052  ;;  %v955_v21 = vsel %vm864_vm1, %v2704_v13, 0.0  ;;  %2072 = vpow2.f32 %v946_v36 }
 0x2ac   :  { %v954_v19 = vadd.f32 %v953_v16, %v952_v15  ;;  %v2055_v23 = vpop.eup %2054  ;;  %v957_v27 = vsel %vm864_vm1, %v2708_v17, 0.0  ;;  %2074 = vpow2.f32 %v948_v41 }
 0x2ad   :  { %v2057_v29 = vpop.eup %2056  ;;  %v959_v33 = vsel %vm864_vm1, %v2055_v23, 0.0 }
 0x2ae   :  { %v956_v25 = vadd.f32 %v955_v21, %v954_v19  ;;  %v2059_v34 = vpop.eup %2058  ;;  %v961_v38 = vsel %vm864_vm1, %v2057_v29, 0.0 }
 0x2af   :  { %v2061_v39 = vpop.eup %2060  ;;  %v963_v44 = vsel %vm864_vm1, %v2059_v34, 0.0 }
 0x2b0   :  { %v958_v32 = vadd.f32 %v957_v27, %v956_v25  ;;  %v2063_v45 = vpop.eup %2062  ;;  %v965_v50 = vsel %vm864_vm1, %v2061_v39, 0.0 }
 0x2b1   :  { %v2065_v52 = vpop.eup %2064  ;;  %v967_v51 = vsel %vm864_vm1, %v2063_v45, 0.0 }
 0x2b2   :  { %v960_v37 = vadd.f32 %v959_v33, %v958_v32  ;;  %v2067_v54 = vpop.eup %2066  ;;  %v969_v58 = vsel %vm864_vm1, %v2065_v52, 0.0 }
 0x2b3   :  { %v2069_v59 = vpop.eup %2068  ;;  %v971_v22 = vsel %vm864_vm1, %v2067_v54, 0.0 }
 0x2b4   :  { %v962_v43 = vadd.f32 %v961_v38, %v960_v37  ;;  %v2071_v20 = vpop.eup %2070  ;;  %v973_v31 = vsel %vm864_vm1, %v2069_v59, 0.0 }
 0x2b5   :  { %v2073_v28 = vpop.eup %2072  ;;  %v975_v42 = vsel %vm864_vm1, %v2071_v20, 0.0 }
 0x2b6   :  { %v964_v48 = vadd.f32 %v963_v44, %v962_v43  ;;  %v2075_v40 = vpop.eup %2074  ;;  %v977_v57 = vsel %vm864_vm1, %v2073_v28, 0.0  ;;  %v1128_v43 = vld [vmem:[%s2982_s8 + $0x30] sm:$0xff]  ;;  %v1129_v44 = vld [vmem:[%s2982_s8 + $0x38] sm:$0xff] }
 0x2b7   :  { %v979_v63 = vsel %vm864_vm1, %v2075_v40, 0.0 }
 0x2b8   :  { %v966_v53 = vadd.f32 %v965_v50, %v964_v48  ;;  %v1130_v48 = vld [vmem:[%s2982_s8 + $0x40] sm:$0xff]  ;;  %v1131_v50 = vld [vmem:[%s2982_s8 + $0x48] sm:$0xff] }
 0x2ba   :  { %v968_v56 = vadd.f32 %v967_v51, %v966_v53  ;;  %v1132_v53 = vld [vmem:[%s2982_s8 + $0x50] sm:$0xff]  ;;  %v1133_v51 = vld [vmem:[%s2982_s8 + $0x58] sm:$0xff] }
 0x2bc   :  { %v970_v60 = vadd.f32 %v969_v58, %v968_v56  ;;  %v1134_v56 = vld [vmem:[%s2982_s8 + $0x60] sm:$0xff]  ;;  %v1135_v58 = vld [vmem:[%s2982_s8 + $0x68] sm:$0xff] }
 0x2be   :  { %v972_v35 = vadd.f32 %v971_v22, %v970_v60  ;;  %v1136_v60 = vld [vmem:[%s2982_s8 + $0x70] sm:$0xff]  ;;  %v1137_v22 = vld [vmem:[%s2982_s8 + $0x78] sm:$0xff] }
 0x2c0   :  { %v974_v26 = vadd.f32 %v973_v31, %v972_v35  ;;  %v1106_v35 = vld [vmem:[%s2981_s7] sm:$0xff]  ;;  %v1107_v31 = vld [vmem:[%s2981_s7 + $0x8] sm:$0xff] }
 0x2c2   :  { %v976_v61 = vadd.f32 %v975_v42, %v974_v26  ;;  %v1108_v26 = vld [vmem:[%s2981_s7 + $0x10] sm:$0xff]  ;;  %v1109_v42 = vld [vmem:[%s2981_s7 + $0x18] sm:$0xff] }
 0x2c4   :  { %v978_v62 = vadd.f32 %v977_v57, %v976_v61  ;;  %v1976_v61 = vpack.c.bf16 %v1109_v42, %v1108_v26  ;;  %v1110_v57 = vld [vmem:[%s2981_s7 + $0x20] sm:$0xff]  ;;  %v1312_v26 = vld [vmem:[%s2984_s10 + $0xc8] sm:$0xff]  ;;  %v1314_v42 = vld [vmem:[%s2984_s10 + $0xd8] sm:$0xff] }
 0x2c6   :  { %v980_v55 = vadd.f32 %v979_v63, %v978_v62  ;;  %v1111_v62 = vld [vmem:[%s2981_s7 + $0x28] sm:$0xff] }
 0x2c7   :  { %v1979_v63 = vpack.c.bf16 %v1111_v62, %v1110_v57  ;;  %v1311_v57 = vld [vmem:[%s2984_s10 + $0xc0] sm:$0xff]  ;;  %v1313_v62 = vld [vmem:[%s2984_s10 + $0xd0] sm:$0xff] }
 0x2c8   :  { %v981_v0 = vrot.slane %v980_v55, 4 }
 0x2ca   :  { %v982_v1 = vadd.f32 %v981_v0, %v980_v55  ;;  %v1112_v55 = vld [vmem:[%s2981_s7 + $0x30] sm:$0xff]  ;;  %v1113_v0 = vld [vmem:[%s2981_s7 + $0x38] sm:$0xff] }
 0x2cc   :  { %v983_v2 = vrot.slane %v982_v1, 2 }
 0x2ce   :  { %v984_v3 = vadd.f32 %v983_v2, %v982_v1  ;;  %v1982_v1 = vpack.c.bf16 %v1113_v0, %v1112_v55  ;;  %v1114_v2 = vld [vmem:[%s2981_s7 + $0x40] sm:$0xff]  ;;  %v1318_v55 = vld [vmem:[%s2984_s10 + $0xf8] sm:$0xff]  ;;  %v2022_v0 = vpack.c.bf16 %v1313_v62, %v1311_v57 }
 0x2d0   :  { %v985_v6 = vrot.slane %v984_v3, 1 }
 0x2d2   :  { %v986_v7 = vadd.f32 %v985_v6, %v984_v3  ;;  %v1115_v3 = vld [vmem:[%s2981_s7 + $0x48] sm:$0xff] }
 0x2d3   :  { %v1985_v6 = vpack.c.bf16 %v1115_v3, %v1114_v2  ;;  %v1315_v2 = vld [vmem:[%s2984_s10 + $0xe0] sm:$0xff]  ;;  %v1317_v3 = vld [vmem:[%s2984_s10 + $0xf0] sm:$0xff] }
 0x2d4   :  { %2076 = vrcp.f32 %v986_v7  ;;  %v1116_v7 = vld [vmem:[%s2981_s7 + $0x50] sm:$0xff] }
 0x2de   :  { %v2077_v11 = vpop.eup %2076 }
 0x2df   :  { %v988_v14 = vmul.f32 %v2077_v11, %v2694_v4  ;;  %v989_v15 = vmul.f32 %v2077_v11, %v2696_v5  ;;  %v990_v16 = vmul.f32 %v2077_v11, %v2700_v10  ;;  %v991_v18 = vmul.f32 %v2077_v11, %v2704_v13  ;;  %v1122_v5 = vld [vmem:[%s2982_s8] sm:$0xff]  ;;  %v1123_v10 = vld [vmem:[%s2982_s8 + $0x8] sm:$0xff]  ;;  %v1124_v13 = vld [vmem:[%s2982_s8 + $0x10] sm:$0xff] }
 0x2e0   :  { %v992_v19 = vmul.f32 %v2077_v11, %v2708_v17  ;;  %v993_v21 = vmul.f32 %v2077_v11, %v2055_v23  ;;  %v994_v24 = vmul.f32 %v2077_v11, %v2057_v29  ;;  %v995_v25 = vmul.f32 %v2077_v11, %v2059_v34  ;;  %v1125_v23 = vld [vmem:[%s2982_s8 + $0x18] sm:$0xff]  ;;  %v1126_v34 = vld [vmem:[%s2982_s8 + $0x20] sm:$0xff] }
 0x2e1   :  { %1004 = vxpose.xlu0.b32.start [1/16] (narrow) %v988_v14, 8  ;;  %v996_v27 = vmul.f32 %v2077_v11, %v2061_v39  ;;  %v997_v30 = vmul.f32 %v2077_v11, %v2063_v45  ;;  %v998_v32 = vmul.f32 %v2077_v11, %v2065_v52  ;;  %v999_v33 = vmul.f32 %v2077_v11, %v2067_v54  ;;  %v1127_v39 = vld [vmem:[%s2982_s8 + $0x28] sm:$0xff] }
 0x2e2   :  { %v1000_v36 = vmul.f32 %v2077_v11, %v2069_v59  ;;  %v1001_v37 = vmul.f32 %v2077_v11, %v2071_v20  ;;  %v1002_v38 = vmul.f32 %v2077_v11, %v2073_v28  ;;  %v1003_v4 = vmul.f32 %v2077_v11, %v2075_v40  ;;  %v1117_v11 = vld [vmem:[%s2981_s7 + $0x58] sm:$0xff] }
 0x2e3   :  { %v1949_v17 = vpack.c.bf16 %v1123_v10, %v1122_v5  ;;  %v1952_v29 = vpack.c.bf16 %v1125_v23, %v1124_v13  ;;  %v1955_v41 = vpack.c.bf16 %v1127_v39, %v1126_v34  ;;  %v1958_v45 = vpack.c.bf16 %v1129_v44, %v1128_v43  ;;  %v1296_v10 = vld [vmem:[%s2984_s10 + $0x48] sm:$0xff]  ;;  %v1298_v13 = vld [vmem:[%s2984_s10 + $0x58] sm:$0xff]  ;;  %v1295_v34 = vld [vmem:[%s2984_s10 + $0x40] sm:$0xff] }
 0x2e4   :  { %v1961_v52 = vpack.c.bf16 %v1131_v50, %v1130_v48  ;;  %v1964_v54 = vpack.c.bf16 %v1133_v51, %v1132_v53  ;;  %v1967_v59 = vpack.c.bf16 %v1135_v58, %v1134_v56  ;;  %v1970_v20 = vpack.c.bf16 %v1137_v22, %v1136_v60  ;;  %v1297_v39 = vld [vmem:[%s2984_s10 + $0x50] sm:$0xff]  ;;  %v1302_v43 = vld [vmem:[%s2984_s10 + $0x78] sm:$0xff]  ;;  %v1304_v51 = vld [vmem:[%s2984_s10 + $0x88] sm:$0xff] }
 0x2e5   :  { %1005 = vxpose.xlu0.b32.cont [2/16] (narrow) %v989_v15, 8  ;;  %1950 = vmatpush3.bf16.msra.mxu0 %v1949_v17  ;;  %v1973_v28 = vpack.c.bf16 %v1107_v31, %v1106_v35  ;;  %v1988_v14 = vpack.c.bf16 %v1117_v11, %v1116_v7  ;;  %v1118_v15 = vld [vmem:[%s2981_s7 + $0x60] sm:$0xff]  ;;  %v1301_v48 = vld [vmem:[%s2984_s10 + $0x70] sm:$0xff]  ;;  %v1308_v60 = vld [vmem:[%s2984_s10 + $0xa8] sm:$0xff] }
 0x2e6   :  { %1951 = vmatprep.subr.bf16.mxu0 %v2165_v8  ;;  %v1303_v56 = vld [vmem:[%s2984_s10 + $0x80] sm:$0xff]  ;;  %v1310_v22 = vld [vmem:[%s2984_s10 + $0xb8] sm:$0xff] }
 0x2e7   :  { %v2016_v35 = vpack.c.bf16 %v1310_v22, %v1308_v60  ;;  %v1307_v31 = vld [vmem:[%s2984_s10 + $0xa0] sm:$0xff] }
 0x2e8   :  { %v1608_v11 = vld [vmem:[%s2983_s9] ss:$0 sm:$0xff]  ;;  %s2168_s9 = smov [#allocation8]  }
 0x2e9   :  { %1006 = vxpose.xlu0.b32.cont [3/16] (narrow) %v990_v16, 8  ;;  %1953 = vmatpush3.bf16.msra.mxu0 %v1952_v29  ;;  %v1119_v16 = vld [vmem:[%s2981_s7 + $0x68] sm:$0xff]  ;;  %v2004_v29 = vpack.c.bf16 %v1298_v13, %v1296_v10 }
 0x2ea   :  { %1954 = vmatprep.subr.bf16.mxu0 %v2165_v8 }
 0x2ed   :  { %1007 = vxpose.xlu0.b32.cont [4/16] (narrow) %v991_v18, 8  ;;  %1956 = vmatpush3.bf16.msra.mxu0 %v1955_v41  ;;  %v1991_v18 = vpack.c.bf16 %v1119_v16, %v1118_v15  ;;  %v1300_v41 = vld [vmem:[%s2984_s10 + $0x68] sm:$0xff] }
 0x2ee   :  { %1957 = vmatprep.subr.bf16.mxu0 %v2165_v8  ;;  %v2008_v44 = vpack.c.bf16 %v1302_v43, %v1300_v41 }
 0x2f1   :  { %1008 = vxpose.xlu0.b32.cont [5/16] (narrow) %v992_v19, 8  ;;  %1959 = vmatpush3.bf16.msra.mxu0 %v1958_v45  ;;  %v1120_v19 = vld [vmem:[%s2981_s7 + $0x70] sm:$0xff]  ;;  %v1299_v45 = vld [vmem:[%s2984_s10 + $0x60] sm:$0xff] }
 0x2f2   :  { %1960 = vmatprep.subr.bf16.mxu0 %v2165_v8  ;;  %v2010_v50 = vpack.c.bf16 %v1301_v48, %v1299_v45 }
 0x2f5   :  { %1009 = vxpose.xlu0.b32.cont [6/16] (narrow) %v993_v21, 8  ;;  %1962 = vmatpush3.bf16.msra.mxu0 %v1961_v52  ;;  %v1121_v21 = vld [vmem:[%s2981_s7 + $0x78] sm:$0xff] }
 0x2f6   :  { %1963 = vmatprep.subr.bf16.mxu0 %v2165_v8 }
 0x2f9   :  { %1010 = vxpose.xlu0.b32.cont [7/16] (narrow) %v994_v24, 8  ;;  %1965 = vmatpush3.bf16.msra.mxu0 %v1964_v54  ;;  %v1994_v24 = vpack.c.bf16 %v1121_v21, %v1120_v19  ;;  %v1306_v54 = vld [vmem:[%s2984_s10 + $0x98] sm:$0xff]  ;;  %v1319_v19 = vld [vmem:[%s2985_s11] sm:$0x3] }
 0x2fa   :  { %1966 = vmatprep.subr.bf16.mxu0 %v2165_v8  ;;  %v2012_v58 = vpack.c.bf16 %v1306_v54, %v1304_v51  ;;  %v1324_v21 = vrot.slane %v1319_v19, %v508_v47 }
 0x2fd   :  { %1011 = vxpose.xlu0.b32.cont [8/16] (narrow) %v995_v25, 8  ;;  %1968 = vmatpush3.bf16.msra.mxu0 %v1967_v59  ;;  %v1288_v25 = vld [vmem:[%s2984_s10 + $0x8] sm:$0xff]  ;;  %v1305_v59 = vld [vmem:[%s2984_s10 + $0x90] sm:$0xff] }
 0x2fe   :  { %1969 = vmatprep.subr.bf16.mxu0 %v2165_v8 }
 0x301   :  { %1012 = vxpose.xlu0.b32.cont [9/16] (narrow) %v996_v27, 8  ;;  %1971 = vmatpush3.bf16.msra.mxu0 %v1970_v20  ;;  %v1290_v27 = vld [vmem:[%s2984_s10 + $0x18] sm:$0xff]  ;;  %v2014_v20 = vpack.c.bf16 %v1305_v59, %v1303_v56 }
 0x305   :  { %1013 = vxpose.xlu0.b32.cont [10/16] (narrow) %v997_v30, 8  ;;  %v1996_v30 = vpack.c.bf16 %v1290_v27, %v1288_v25 }
 0x307   :  { %1997 = vmatprep.subr.bf16.mxu0 %v1996_v30 }
 0x309   :  { %1014 = vxpose.xlu0.b32.cont [11/16] (narrow) %v998_v32, 8  ;;  %v1287_v32 = vld [vmem:[%s2984_s10] sm:$0xff] }
 0x30d   :  { %1015 = vxpose.xlu0.b32.cont [12/16] (narrow) %v999_v33, 8  ;;  %v1294_v33 = vld [vmem:[%s2984_s10 + $0x38] sm:$0xff] }
 0x311   :  { %1016 = vxpose.xlu0.b32.cont [13/16] (narrow) %v1000_v36, 8 }
 0x315   :  { %1017 = vxpose.xlu0.b32.cont [14/16] (narrow) %v1001_v37, 8 }
 0x319   :  { %1018 = vxpose.xlu0.b32.cont [15/16] (narrow) %v1002_v38, 8  ;;  %v1291_v38 = vld [vmem:[%s2984_s10 + $0x20] sm:$0xff] }
 0x31d   :  { %1019 = vxpose.xlu0.b32.end [16/16] (narrow) %v1003_v4, 8  ;;  %v1293_v4 = vld [vmem:[%s2984_s10 + $0x30] sm:$0xff] }
 0x31e   :  { %v2002_v23 = vpack.c.bf16 %v1293_v4, %v1291_v38 }
 0x361   :  { %v1020_v40 = vpop.trf.xlu0 }
 0x362   :  { %1796 = vmatmul.mubr.f32.vlgmr.msra.gmra.mrb[2].mxu1 %v1020_v40 }
 0x363   :  { %1974 = vmatpush3.bf16.msra.mxu1 %v1973_v28  ;;  %1865 = vmatprep.mubr.msk.f32.mxu1 %vm2167_vm0, %v2166_v9  ;;  %v1309_v28 = vld [vmem:[%s2984_s10 + $0xb0] sm:$0xff] }
 0x364   :  { %1975 = vmatprep.subr.bf16.mxu1 %v2165_v8  ;;  %v2018_v40 = vpack.c.bf16 %v1309_v28, %v1307_v31 }
 0x367   :  { %1977 = vmatpush3.bf16.msra.mxu1 %v1976_v61  ;;  %v2020_v61 = vpack.c.bf16 %v1314_v42, %v1312_v26 }
 0x368   :  { %1978 = vmatprep.subr.bf16.mxu1 %v2165_v8 }
 0x36b   :  { %1980 = vmatpush3.bf16.msra.mxu1 %v1979_v63  ;;  %v1316_v63 = vld [vmem:[%s2984_s10 + $0xe8] sm:$0xff] }
 0x36c   :  { %1981 = vmatprep.subr.bf16.mxu1 %v2165_v8 }
 0x36f   :  { %1983 = vmatpush3.bf16.msra.mxu1 %v1982_v1  ;;  %v2024_v1 = vpack.c.bf16 %v1318_v55, %v1316_v63 }
 0x370   :  { %1984 = vmatprep.subr.bf16.mxu1 %v2165_v8 }
 0x373   :  { %1986 = vmatpush3.bf16.msra.mxu1 %v1985_v6  ;;  %v2026_v6 = vpack.c.bf16 %v1317_v3, %v1315_v2 }
 0x374   :  { %1987 = vmatprep.subr.bf16.mxu1 %v2165_v8 }
 0x377   :  { %1989 = vmatpush3.bf16.msra.mxu1 %v1988_v14 }
 0x378   :  { %1990 = vmatprep.subr.bf16.mxu1 %v2165_v8 }
 0x37b   :  { %1992 = vmatpush3.bf16.msra.mxu1 %v1991_v18 }
 0x37c   :  { %1993 = vmatprep.subr.bf16.mxu1 %v2165_v8  ;;  %v1289_v8 = vld [vmem:[%s2984_s10 + $0x10] sm:$0xff] }
 0x37d   :  { %v1998_v36 = vpack.c.bf16 %v1289_v8, %v1287_v32 }
 0x37f   :  { %1995 = vmatpush3.bf16.msra.mxu1 %v1994_v24  ;;  %v1328_v24 = vrot.slane %v1319_v19, %v512_v49 }
 0x382   :  { %1866 = vmatmul.mubr.f32.vlgmr.msra.gmra.mrb[4].mxu1 %v2529_v12  ;;  %v1292_v12 = vld [vmem:[%s2984_s10 + $0x28] sm:$0xff]  ;;  %s1435_s10 = sshll.u32 %s2168_s9, 4  ;;  %s1436_s10 = int_to_ptr.vmem [resolvable:$true] %s1435_s10 }
 0x383   :  { %v2000_v37 = vpack.c.bf16 %v1294_v33, %v1292_v12  ;;  %s2098_s11 = scalar_lea.vmem %s1436_s10, 128  ;;  %p2103_p6 = scmp.lt.s32.totalorder %s1436_s10, %s1436_s10 }
 0x384   :  { %p2099_p5 = scmp.ne.s32.totalorder %s1436_s10, %s2098_s11  ;;  %p2104_p7 = scmp.lt.s32.totalorder %s2098_s11, %s2098_s11 }
 0x386   :  { %p2105_p8 = por %p2104_p7, %p2103_p6 }
 0x388   :  { %p2106_p9 = pnand %p2105_p8, %p2099_p5 }
 0x435   :  { %v1102_v5 = vpop.f32.mrb[2].mxu1 }
 0x436   :  { %v1797_v17 = vpop.f32.mrb[3].mxu1  ;;  %1831 = vmatmul.mubr.f32.vlgmr.msra.gmra.mrb[18].mxu0 %v1102_v5 }
 0x437   :  { %1999 = vmatpush1.bf16.msra.mxu0 %v1998_v36  ;;  %1395 = vmatprep.mubr.f32.mxu0 %v2166_v9  ;;  %v2006_v9 = vpack.c.bf16 %v1297_v39, %v1295_v34 }
 0x438   :  { %2001 = vmatprep.subr.bf16.mxu0 %v2000_v37 }
 0x43b   :  { %2003 = vmatpush1.bf16.msra.mxu0 %v2002_v23 }
 0x43c   :  { %2005 = vmatprep.subr.bf16.mxu0 %v2004_v29 }
 0x43f   :  { %2007 = vmatpush1.bf16.msra.mxu0 %v2006_v9 }
 0x440   :  { %2009 = vmatprep.subr.bf16.mxu0 %v2008_v44 }
 0x443   :  { %2011 = vmatpush1.bf16.msra.mxu0 %v2010_v50 }
 0x444   :  { %2013 = vmatprep.subr.bf16.mxu0 %v2012_v58 }
 0x447   :  { %2015 = vmatpush1.bf16.msra.mxu0 %v2014_v20 }
 0x448   :  { %2017 = vmatprep.subr.bf16.mxu0 %v2016_v35 }
 0x44b   :  { %2019 = vmatpush1.bf16.msra.mxu0 %v2018_v40 }
 0x44c   :  { %2021 = vmatprep.subr.bf16.mxu0 %v2020_v61 }
 0x44f   :  { %2023 = vmatpush1.bf16.msra.mxu0 %v2022_v0 }
 0x450   :  { %2025 = vmatprep.subr.bf16.mxu0 %v2024_v1 }
 0x453   :  { %2027 = vmatpush1.bf16.msra.mxu0 %v2026_v6 }
 0x455   :  { %v1274_v52 = vpop.f32.mrb[4].mxu1 }
 0x456   :  { %v1867_v53 = vpop.f32.mrb[5].mxu1 }
 0x509   :  { %v1204_v7 = vpop.f32.mrb[18].mxu0 }
 0x50a   :  { %v1275_v14 = vadd.f32 %v1274_v52, %v1204_v7  ;;  %v1832_v15 = vpop.f32.mrb[19].mxu0 }
 0x50c   :  { %v1285_v16 = vadd.f32 %v1608_v11, %v1275_v14 }
 0x50e   :  { %2078 = vtanh.f32 %v1285_v16 }
 0x518   :  { %v2079_v18 = vpop.eup %2078 }
 0x519   :  { %1396 = vmatmul.mubr.f32.vlgmr.msra.gmra.mrb[20].mxu0 %v2079_v18 }
 0x5ec   :  { %v1397_v25 = vpop.f32.mrb[20].mxu0 }
 0x5ed   :  { %v1398_v27 = vadd.f32 %v1397_v25, %v1324_v21  ;;  %v1399_v30 = vpop.f32.mrb[21].mxu0 }
 0x5ee   :  { %v1400_v32 = vadd.f32 %v1399_v30, %v1328_v24 }
 0x5f0   :  { %v1402_v8 = vmax.f32 %v1398_v27, %v1400_v32 }
 0x5f2   :  { %1403 = vmax.xlane.f32.xlu1 %v1402_v8 }
 0x67f   :  { %v1404_v12 = vpop.xlane.xlu1 %1403 }
 0x680   :  { %v1405_v33 = vsub.f32 %v1398_v27, %v1404_v12  ;;  %v1406_v36 = vsub.f32 %v1400_v32, %v1404_v12 }
 0x682   :  { %v1407_v37 = vmul.f32 1.442695, %v1405_v33  ;;  %v1409_v38 = vmul.f32 1.442695, %v1406_v36 }
 0x684   :  { %2080 = vpow2.f32 %v1407_v37 }
 0x685   :  { %2082 = vpow2.f32 %v1409_v38 }
 0x68e   :  { %v2081_v4 = vpop.eup %2080 }
 0x68f   :  { %v2083_v5 = vpop.eup %2082 }
 0x690   :  { %v1411_v10 = vadd.f32 %v2083_v5, %v2081_v4 }
 0x692   :  { %1412 = vadd.xlane.f32.xlu1 %v1411_v10 }
 0x693   :  { %2109 = shalt.err (!%p2106_p9)
}
 0x694   :  { %s2110_s16 = scalar_lea.hbm %s2987_s13, 128 }
 0x695   :  { %p2111_p10 = scmp.ne.s32.totalorder %s2987_s13, %s2110_s16  ;;  %p2114_p11 = scmp.lt.u32.totalorder %s2110_s16, %s2987_s13 }
 0x697   :  { %p2116_p12 = pnand %p2114_p11, %p2111_p10 }
 0x699   :  { %2119 = shalt.err (!%p2116_p12)
}
 0x69a   :  { %1438 = dma.vmem_to_hbm [thread:$0]  %s1436_s10, 128, %s2987_s13, [#allocation9]  }
 0x69b   :  { %s2169_s8 = smov [#allocation7]  }
 0x69c   :  { %s1425_s5 = sshll.u32 %s2169_s8, 4  ;;  %s1426_s5 = int_to_ptr.vmem [resolvable:$true] %s1425_s5 }
 0x69d   :  { %s2120_s6 = scalar_lea.vmem %s1426_s5, 256  ;;  %p2125_p0 = scmp.lt.s32.totalorder %s1426_s5, %s1426_s5 }
 0x69e   :  { %p2121_p13 = scmp.ne.s32.totalorder %s1426_s5, %s2120_s6  ;;  %p2126_p1 = scmp.lt.s32.totalorder %s2120_s6, %s2120_s6 }
 0x6a0   :  { %p2127_p2 = por %p2126_p1, %p2125_p0 }
 0x6a2   :  { %p2128_p3 = pnand %p2127_p2, %p2121_p13 }
 0x71f   :  { %v1413_v46 = vpop.xlane.xlu1 %1412 }
 0x720   :  { %2084 = vrcp.f32 %v1413_v46 }
 0x72a   :  { %v2085_v47 = vpop.eup %2084 }
 0x72b   :  { %v1415_v49 = vmul.f32 %v2085_v47, %v2081_v4  ;;  %v1416_v13 = vmul.f32 %v2085_v47, %v2083_v5 }
 0x72d   :  { %1417 = vst [vmem:[#allocation7] sm:$0xff] %v1415_v49  ;;  %1418 = vst [vmem:[#allocation7 + $0x8] sm:$0xff] %v1416_v13 }
 0x72e   :  { %2131 = shalt.err (!%p2128_p3)
}
 0x72f   :  { %s2132_s13 = scalar_lea.hbm %s2986_s12, 256 }
 0x730   :  { %p2133_p4 = scmp.ne.s32.totalorder %s2986_s12, %s2132_s13  ;;  %p2136_p5 = scmp.lt.u32.totalorder %s2132_s13, %s2986_s12 }
 0x732   :  { %p2138_p6 = pnand %p2136_p5, %p2133_p4 }
 0x734   :  { %2141 = shalt.err (!%p2138_p6)
}
 0x735   :  { %1428 = dma.vmem_to_hbm [thread:$0]  %s1426_s5, 256, %s2986_s12, [#allocation5]  }
 0x736   :  { %2160 = dma.done.wait [#allocation5], 256  }
 0x737   :  { %2161 = vsyncadd [#allocation5], 4294967040 }
 0x738   :  { %2162 = dma.done.wait [#allocation9], 128  }
 0x739   :  { %2163 = vsyncadd [#allocation9], 4294967168 }
 0x73a   :  { %1445 = vsyncpa [#allocation5], 1 }
 0x73b   :  { %1446 = vsyncpa [#allocation9], 1 }
 0x73c   :  { %1447 = vsyncpa [#allocation6], 1 }
 0x73d   :  { %1448 = vsyncmov [#allocation3] }
 0x740   :  { %s1449_s27 = vpop.sfrf %1448 }
 0x741   :  { %p1609_p7 = scmp.ne.s32.totalorder %s1449_s27, 0 }
 0x743   :  { %1453 = shalt.err (%p1609_p7)  }
 0x744   :  { %1455 = vsyncmov [#allocation3 + $0x1] }
 0x747   :  { %s1456_s3 = vpop.sfrf %1455 }
 0x748   :  { %p1610_p8 = scmp.ne.s32.totalorder %s1456_s3, 0 }
 0x74a   :  { %1460 = shalt.err (%p1610_p8)  }
 0x74b   :  { %1462 = vsyncmov [#allocation3 + $0x2] }
 0x74e   :  { %s1463_s28 = vpop.sfrf %1462 }
 0x74f   :  { %p1611_p9 = scmp.ne.s32.totalorder %s1463_s28, 0 }
 0x751   :  { %1467 = shalt.err (%p1611_p9)  }
 0x752   :  { %1469 = vsyncmov [#allocation3 + $0x3] }
 0x755   :  { %s1470_s12 = vpop.sfrf %1469 }
 0x756   :  { %p1612_p10 = scmp.ne.s32.totalorder %s1470_s12, 0 }
 0x758   :  { %1474 = shalt.err (%p1612_p10)  }
 0x759   :  { %1476 = vsyncmov [#allocation3 + $0x4] }
 0x75c   :  { %s1477_s29 = vpop.sfrf %1476 }
 0x75d   :  { %p1613_p11 = scmp.ne.s32.totalorder %s1477_s29, 0 }
 0x75f   :  { %1481 = shalt.err (%p1613_p11)  }
 0x760   :  { %1483 = vsyncmov [#allocation3 + $0x5] }
 0x763   :  { %s1484_s4 = vpop.sfrf %1483 }
 0x764   :  { %p1614_p12 = scmp.ne.s32.totalorder %s1484_s4, 0 }
 0x766   :  { %1488 = shalt.err (%p1614_p12)  }
 0x767   :  { %1490 = vsyncmov [#allocation3 + $0x6] }
 0x76a   :  { %s1491_s30 = vpop.sfrf %1490 }
 0x76b   :  { %p1615_p13 = scmp.ne.s32.totalorder %s1491_s30, 0 }
 0x76d   :  { %1495 = shalt.err (%p1615_p13)  }
 0x76e   :  { %1497 = vsyncmov [#allocation3 + $0x7] }
 0x771   :  { %s1498_s9 = vpop.sfrf %1497 }
 0x772   :  { %p1616_p0 = scmp.ne.s32.totalorder %s1498_s9, 0 }
 0x774   :  { %1502 = shalt.err (%p1616_p0)  }

</bundles_post_ra>
